<compile_context>
chip_gen: v7x
topology: tpu7x:2x2x1
jax: 0.10.0
libtpu: 0.0.40
codegen_flags: <defaults>
</compile_context>

<pallas_src>
import jax
import jax.numpy as jnp
import numpy as np
from jax.experimental import pallas as pl
from jax.experimental.pallas import tpu as pltpu


# ------------------------------ fused kernel ------------------------------- #

def _make_diffnet_kernel(n_blocks, p_packed):
    """Kernel body closure; one grid step == one batch element."""

    def kernel(*refs):
        (pin_ref, m_ref, eyi_ref, eyit_ref, eyo_ref,
         wexp_ref, eshift_ref) = refs[:7]
        blk = refs[7:7 + 9 * n_blocks]
        a_ref, ab_ref, bw_ref, bb_ref, out_ref = refs[7 + 9 * n_blocks:]

        f32 = jnp.float32

        def mm(a, b):
            return jnp.dot(a, b, preferred_element_type=f32)

        xin = pin_ref[...]                       # (T, IN+3) packed [x | y]
        mcol = m_ref[...]                        # (T, 1)

        # masked temporal mean of the root trajectory: mean_y = sum(y)/sum(mask)
        yrows = mm(xin, eyi_ref[...])            # (T, 3) extract y columns
        mean_y = (jnp.sum(yrows, axis=0, keepdims=True) /
                  jnp.sum(mcol, axis=0, keepdims=True))           # (1, 3)

        # expand 1x1 convs + folded BN + relu (x|y packed block-diagonally);
        # mean_y is subtracted only from the y columns via the embed selector.
        centered = xin - mm(mean_y, eyit_ref[...])                # (T, IN+3)
        h = jnp.maximum(mm(centered, wexp_ref[...]) + eshift_ref[...], 0.0)  # (T, P)

        # mask broadcast across the packed channel slab (keeps all dots lane-wide)
        m = jnp.broadcast_to(mcol, (mcol.shape[0], p_packed))     # (T, P)

        for k in range(n_blocks):
            s0, s1, s2, w0, w1, w2, sshift, wsm, mshift = blk[9 * k: 9 * (k + 1)]
            s0v, s1v, s2v = s0[...], s1[...], s2[...]

            # tap-1 gather doubles as the 1::inflation residual
            g1 = mm(s1v, h)                                       # (t_out, P)

            # stride_mask = 3-tap sum of mask; multiplier
            sm = mm(s0v + s1v + s2v, m)                           # (t_out, P)
            new_m = (sm != 0.0).astype(f32)
            mult = 3.0 * pl.reciprocal(sm + 1e-6, approx=True) * new_m

            # strided 3-tap conv (BN scale folded into taps) * mult, + shift, relu
            sx = (mm(mm(s0v, h), w0[...]) + mm(g1, w1[...]) +
                  mm(mm(s2v, h), w2[...]))                        # (t_out, P)
            hb = jnp.maximum(sx * mult + sshift[...], 0.0)

            # 1x1 smooth conv (BN scale folded) + shift + relu, residual add
            hb = jnp.maximum(mm(hb, wsm[...]) + mshift[...], 0.0)
            h = hb + g1
            m = new_m

        # heads: relu(a_lin) -> b_lin, packed block-diagonally; add mean_y to y cols
        ha = jnp.maximum(mm(h, a_ref[...]) + ab_ref[...], 0.0)    # (1, P)
        out_ref[...] = (mm(ha, bw_ref[...]) + bb_ref[...] +
                        mm(mean_y, eyo_ref[...]))                 # (1, IN+3)

    return kernel


# ------------------------------ JAX glue ----------------------------------- #

def diffnet_forward_pallas(params, x, y, mask, ones, args):
    # `ones` (1,1,3) is the all-ones mask-conv kernel; the 3-tap mask sum is done
    # in-kernel with the selection matrices, so it is not needed as data.
    del ones
    B, IN, T = x.shape
    C = args['channels']
    RC = args['root_channels']
    s = args['inflation']
    nb = args['n_blocks']
    P_in = IN + 3
    P = C + RC
    P_out = IN + 3
    f32 = jnp.float32

    # NCL -> (B, T, channels) packed rows, mask as a (B, T, 1) column
    x_t = jnp.transpose(x, (0, 2, 1)).astype(f32)
    y_t = jnp.transpose(y, (0, 2, 1)).astype(f32)
    packed_in = jnp.concatenate([x_t, y_t], axis=-1)          # (B, T, IN+3)
    mask_t = jnp.transpose(mask, (0, 2, 1)).astype(f32)       # (B, T, 1)

    # static selectors: extract / embed the y columns of the packed slabs
    eyi = np.zeros((P_in, 3), np.float32)
    eyi[IN:, :] = np.eye(3, dtype=np.float32)
    eyo = np.zeros((3, P_out), np.float32)
    eyo[:, IN:] = np.eye(3, dtype=np.float32)
    Eyi = jnp.asarray(eyi)
    EyiT = jnp.asarray(eyi.T)
    Eyo = jnp.asarray(eyo)

    def tap_sel(t_in, t_out, tap):
        S = np.zeros((t_out, t_in), np.float32)
        S[np.arange(t_out), np.arange(t_out) * s + tap] = 1.0
        return jnp.asarray(S)

    def bdiag(a, b):
        a = jnp.asarray(a, f32)
        b = jnp.asarray(b, f32)
        out = jnp.zeros((a.shape[0] + b.shape[0], a.shape[1] + b.shape[1]), f32)
        out = out.at[:a.shape[0], :a.shape[1]].set(a)
        out = out.at[a.shape[0]:, a.shape[1]:].set(b)
        return out

    def cat(pa, pb):
        return jnp.concatenate([params[pa], params[pb]])[None, :].astype(f32)

    # expand stage: BN scale folded into weights (inference-mode BN)
    w_exp = bdiag(params['expand_w'][:, :, 0].T * params['expand_bn_scale'][None, :],
                  params['root_expand_w'][:, :, 0].T * params['root_expand_bn_scale'][None, :])
    e_shift = cat('expand_bn_shift', 'root_expand_bn_shift')

    # per-block operands
    block_ops = []
    t_cur = T
    for k in range(nb):
        t_out = (t_cur - 3) // s + 1
        assert t_out >= 1 and len(range(1, t_cur, s)) == t_out, (
            "temporal length incompatible with stride / residual alignment")
        s_scale = jnp.concatenate([params[f'stride_bn_{k}_scale'],
                                   params[f'root_stride_bn_{k}_scale']])[None, :]
        taps_w = [bdiag(params[f'stride_w_{k}'][:, :, tp].T,
                        params[f'root_stride_w_{k}'][:, :, tp].T) * s_scale
                  for tp in range(3)]
        m_scale = jnp.concatenate([params[f'smooth_bn_{k}_scale'],
                                   params[f'root_smooth_bn_{k}_scale']])[None, :]
        w_smooth = bdiag(params[f'smooth_w_{k}'][:, :, 0].T,
                         params[f'root_smooth_w_{k}'][:, :, 0].T) * m_scale
        block_ops += [tap_sel(t_cur, t_out, 0), tap_sel(t_cur, t_out, 1),
                      tap_sel(t_cur, t_out, 2),
                      taps_w[0], taps_w[1], taps_w[2],
                      cat(f'stride_bn_{k}_shift', f'root_stride_bn_{k}_shift'),
                      w_smooth,
                      cat(f'smooth_bn_{k}_shift', f'root_smooth_bn_{k}_shift')]
        t_cur = t_out
    assert t_cur == 1   # mirrors x.squeeze(-1) / y.squeeze(-1) in the PyTorch code

    # heads
    a_w = bdiag(params['a_w'].T, params['root_a_w'].T)
    a_b = cat('a_b', 'root_a_b')
    b_w = bdiag(params['b_w'].T, params['root_b_w'].T)
    b_b = cat('b_b', 'root_b_b')

    shared = [Eyi, EyiT, Eyo, w_exp, e_shift] + block_ops + [a_w, a_b, b_w, b_b]

    in_specs = [pl.BlockSpec((None, T, P_in), lambda b: (b, 0, 0)),
                pl.BlockSpec((None, T, 1), lambda b: (b, 0, 0))]
    in_specs += [pl.BlockSpec(w.shape, lambda b: (0, 0)) for w in shared]

    out = pl.pallas_call(
        _make_diffnet_kernel(nb, P),
        grid=(B,),
        out_shape=jax.ShapeDtypeStruct((B, 1, P_out), f32),
        in_specs=in_specs,
        out_specs=pl.BlockSpec((None, 1, P_out), lambda b: (b, 0, 0)),
        compiler_params=pltpu.CompilerParams(
            dimension_semantics=("parallel",)),
    )(packed_in, mask_t, *shared)

    out = out.reshape(B, P_out)
    return out[:, :IN], out[:, IN:]


# ----------------------- pure-JAX reference (for checking) ----------------- #

def _conv1d(x, w, stride=1):
    return jax.lax.conv_general_dilated(
        x, w, window_strides=(stride,), padding='VALID',
        dimension_numbers=('NCH', 'OIH', 'NCH'))


def diffnet_forward_reference(params, x, y, mask, ones, args):
    s = args['inflation']
    relu = jax.nn.relu

    def bn(t, pref):
        return (t * params[pref + '_scale'][None, :, None]
                + params[pref + '_shift'][None, :, None])

    mean_y = jnp.sum(y, -1, keepdims=True) / jnp.sum(mask, -1, keepdims=True)
    x = relu(bn(_conv1d(x, params['expand_w']), 'expand_bn'))
    y = relu(bn(_conv1d(y - mean_y, params['root_expand_w']), 'root_expand_bn'))
    m = mask
    for k in range(args['n_blocks']):
        res_x = x[:, :, 1::s]
        res_y = y[:, :, 1::s]
        sx = _conv1d(x, params[f'stride_w_{k}'], stride=s)
        sy = _conv1d(y, params[f'root_stride_w_{k}'], stride=s)
        sm = _conv1d(m, ones, stride=s)
        m = (sm != 0).astype(jnp.float32)
        mult = 3.0 / (sm + 1e-6) * m
        sx = sx * mult
        sy = sy * mult
        x = relu(bn(sx, f'stride_bn_{k}'))
        y = relu(bn(sy, f'root_stride_bn_{k}'))
        x = relu(bn(_conv1d(x, params[f'smooth_w_{k}']), f'smooth_bn_{k}'))
        y = relu(bn(_conv1d(y, params[f'root_smooth_w_{k}']), f'root_smooth_bn_{k}'))
        x = x + res_x
        y = y + res_y
    x = x[:, :, 0]
    y = y[:, :, 0]
    mean_y = mean_y[:, :, 0]
    ox = relu(x @ params['a_w'].T + params['a_b']) @ params['b_w'].T + params['b_b']
    oy = (relu(y @ params['root_a_w'].T + params['root_a_b']) @ params['root_b_w'].T
          + params['root_b_b']) + mean_y
    return ox, oy


# ------------------------------ parameters --------------------------------- #

def init_params(key, args):
    C = args['channels']
    RC = args['root_channels']
    IN = (args['n_joints'] - 1) * 3
    params = {}

    def nxt():
        nonlocal key
        key, sub = jax.random.split(key)
        return sub

    def w(shape, std=0.1):
        return (std * jax.random.normal(nxt(), shape)).astype(jnp.float32)

    def bn(n, prefix):
        params[prefix + '_scale'] = (1.0 + 0.1 * jax.random.normal(nxt(), (n,))).astype(jnp.float32)
        params[prefix + '_shift'] = (0.1 * jax.random.normal(nxt(), (n,))).astype(jnp.float32)

    params['expand_w'] = w((C, IN, 1))
    bn(C, 'expand_bn')
    params['root_expand_w'] = w((RC, 3, 1))
    bn(RC, 'root_expand_bn')
    for k in range(args['n_blocks']):
        params[f'stride_w_{k}'] = w((C, C, 3))
        bn(C, f'stride_bn_{k}')
        params[f'root_stride_w_{k}'] = w((RC, RC, 3))
        bn(RC, f'root_stride_bn_{k}')
        params[f'smooth_w_{k}'] = w((C, C, 1))
        bn(C, f'smooth_bn_{k}')
        params[f'root_smooth_w_{k}'] = w((RC, RC, 1))
        bn(RC, f'root_smooth_bn_{k}')
    params['a_w'] = w((C, C), 0.01)
    params['a_b'] = jnp.zeros((C,), jnp.float32)
    params['root_a_w'] = w((RC, RC), 0.01)
    params['root_a_b'] = jnp.zeros((RC,), jnp.float32)
    params['b_w'] = w((IN, C), 0.01)
    params['b_b'] = jnp.zeros((IN,), jnp.float32)
    params['root_b_w'] = w((3, RC), 0.01)
    params['root_b_b'] = jnp.zeros((3,), jnp.float32)
    return params


# --------------------------------- main ------------------------------------ #

if __name__ == "__main__":
    args = dict(n_joints=17, channels=32, root_channels=16, n_blocks=2, inflation=3)
    B = 2
    T = args['inflation'] ** args['n_blocks']   # 9 -> temporal dim becomes 1 after 2 blocks
    IN = (args['n_joints'] - 1) * 3             # 48

    key = jax.random.PRNGKey(0)
    key, kx, ky, km, kp = jax.random.split(key, 5)
    x = jax.random.normal(kx, (B, IN, T), jnp.float32)
    y = jax.random.normal(ky, (B, 3, T), jnp.float32)
    mask = (jax.random.uniform(km, (B, 1, T)) > 0.3).astype(jnp.float32)
    mask = mask.at[:, :, 0].set(1.0)            # guarantee non-empty mask per sequence
    ones = jnp.ones((1, 1, 3), jnp.float32)

    params = init_params(kp, args)

    out_x, out_y = diffnet_forward_pallas(params, x, y, mask, ones, args)
    out_x = jax.block_until_ready(out_x)
    out_y = jax.block_until_ready(out_y)

    ref_x, ref_y = diffnet_forward_reference(params, x, y, mask, ones, args)
    np.testing.assert_allclose(np.asarray(out_x), np.asarray(ref_x), rtol=1e-2, atol=1e-2)
    np.testing.assert_allclose(np.asarray(out_y), np.asarray(ref_y), rtol=1e-2, atol=1e-2)
    assert out_x.shape == (B, IN) and out_y.shape == (B, 3)
    print("KERNEL_OK")
</pallas_src>

<mosaic_0001>
module attributes {stable_mosaic.version = 11 : i64} {
  func.func @kernel(%arg0: i32, %arg1: memref<1x9x51xf32, #tpu.memory_space<vmem>>, %arg2: memref<1x9x1xf32, #tpu.memory_space<vmem>>, %arg3: memref<51x3xf32, #tpu.memory_space<vmem>>, %arg4: memref<3x51xf32, #tpu.memory_space<vmem>>, %arg5: memref<3x51xf32, #tpu.memory_space<vmem>>, %arg6: memref<51x48xf32, #tpu.memory_space<vmem>>, %arg7: memref<1x48xf32, #tpu.memory_space<vmem>>, %arg8: memref<3x9xf32, #tpu.memory_space<vmem>>, %arg9: memref<3x9xf32, #tpu.memory_space<vmem>>, %arg10: memref<3x9xf32, #tpu.memory_space<vmem>>, %arg11: memref<48x48xf32, #tpu.memory_space<vmem>>, %arg12: memref<48x48xf32, #tpu.memory_space<vmem>>, %arg13: memref<48x48xf32, #tpu.memory_space<vmem>>, %arg14: memref<1x48xf32, #tpu.memory_space<vmem>>, %arg15: memref<48x48xf32, #tpu.memory_space<vmem>>, %arg16: memref<1x48xf32, #tpu.memory_space<vmem>>, %arg17: memref<1x3xf32, #tpu.memory_space<vmem>>, %arg18: memref<1x3xf32, #tpu.memory_space<vmem>>, %arg19: memref<1x3xf32, #tpu.memory_space<vmem>>, %arg20: memref<48x48xf32, #tpu.memory_space<vmem>>, %arg21: memref<48x48xf32, #tpu.memory_space<vmem>>, %arg22: memref<48x48xf32, #tpu.memory_space<vmem>>, %arg23: memref<1x48xf32, #tpu.memory_space<vmem>>, %arg24: memref<48x48xf32, #tpu.memory_space<vmem>>, %arg25: memref<1x48xf32, #tpu.memory_space<vmem>>, %arg26: memref<48x48xf32, #tpu.memory_space<vmem>>, %arg27: memref<1x48xf32, #tpu.memory_space<vmem>>, %arg28: memref<48x51xf32, #tpu.memory_space<vmem>>, %arg29: memref<1x51xf32, #tpu.memory_space<vmem>>, %arg30: memref<1x1x51xf32, #tpu.memory_space<vmem>>) attributes {dimension_semantics = [#tpu.dimension_semantics<parallel>], iteration_bounds = array<i64: 2>, scalar_prefetch = 0 : i64, scratch_operands = 0 : i64, tpu.core_type = #tpu.core_type<tc>, window_params = [{transform_indices = @transform_0, window_bounds = array<i64: 1, 9, 51>}, {transform_indices = @transform_1, window_bounds = array<i64: 1, 9, 1>}, {pipeline_mode = #tpu.pipeline_mode<synchronous>, transform_indices = @transform_2, window_bounds = array<i64: 51, 3>}, {pipeline_mode = #tpu.pipeline_mode<synchronous>, transform_indices = @transform_3, window_bounds = array<i64: 3, 51>}, {pipeline_mode = #tpu.pipeline_mode<synchronous>, transform_indices = @transform_4, window_bounds = array<i64: 3, 51>}, {pipeline_mode = #tpu.pipeline_mode<synchronous>, transform_indices = @transform_5, window_bounds = array<i64: 51, 48>}, {pipeline_mode = #tpu.pipeline_mode<synchronous>, transform_indices = @transform_6, window_bounds = array<i64: 1, 48>}, {pipeline_mode = #tpu.pipeline_mode<synchronous>, transform_indices = @transform_7, window_bounds = array<i64: 3, 9>}, {pipeline_mode = #tpu.pipeline_mode<synchronous>, transform_indices = @transform_8, window_bounds = array<i64: 3, 9>}, {pipeline_mode = #tpu.pipeline_mode<synchronous>, transform_indices = @transform_9, window_bounds = array<i64: 3, 9>}, {pipeline_mode = #tpu.pipeline_mode<synchronous>, transform_indices = @transform_10, window_bounds = array<i64: 48, 48>}, {pipeline_mode = #tpu.pipeline_mode<synchronous>, transform_indices = @transform_11, window_bounds = array<i64: 48, 48>}, {pipeline_mode = #tpu.pipeline_mode<synchronous>, transform_indices = @transform_12, window_bounds = array<i64: 48, 48>}, {pipeline_mode = #tpu.pipeline_mode<synchronous>, transform_indices = @transform_13, window_bounds = array<i64: 1, 48>}, {pipeline_mode = #tpu.pipeline_mode<synchronous>, transform_indices = @transform_14, window_bounds = array<i64: 48, 48>}, {pipeline_mode = #tpu.pipeline_mode<synchronous>, transform_indices = @transform_15, window_bounds = array<i64: 1, 48>}, {pipeline_mode = #tpu.pipeline_mode<synchronous>, transform_indices = @transform_16, window_bounds = array<i64: 1, 3>}, {pipeline_mode = #tpu.pipeline_mode<synchronous>, transform_indices = @transform_17, window_bounds = array<i64: 1, 3>}, {pipeline_mode = #tpu.pipeline_mode<synchronous>, transform_indices = @transform_18, window_bounds = array<i64: 1, 3>}, {pipeline_mode = #tpu.pipeline_mode<synchronous>, transform_indices = @transform_19, window_bounds = array<i64: 48, 48>}, {pipeline_mode = #tpu.pipeline_mode<synchronous>, transform_indices = @transform_20, window_bounds = array<i64: 48, 48>}, {pipeline_mode = #tpu.pipeline_mode<synchronous>, transform_indices = @transform_21, window_bounds = array<i64: 48, 48>}, {pipeline_mode = #tpu.pipeline_mode<synchronous>, transform_indices = @transform_22, window_bounds = array<i64: 1, 48>}, {pipeline_mode = #tpu.pipeline_mode<synchronous>, transform_indices = @transform_23, window_bounds = array<i64: 48, 48>}, {pipeline_mode = #tpu.pipeline_mode<synchronous>, transform_indices = @transform_24, window_bounds = array<i64: 1, 48>}, {pipeline_mode = #tpu.pipeline_mode<synchronous>, transform_indices = @transform_25, window_bounds = array<i64: 48, 48>}, {pipeline_mode = #tpu.pipeline_mode<synchronous>, transform_indices = @transform_26, window_bounds = array<i64: 1, 48>}, {pipeline_mode = #tpu.pipeline_mode<synchronous>, transform_indices = @transform_27, window_bounds = array<i64: 48, 51>}, {pipeline_mode = #tpu.pipeline_mode<synchronous>, transform_indices = @transform_28, window_bounds = array<i64: 1, 51>}, {transform_indices = @transform_29, window_bounds = array<i64: 1, 1, 51>}]} {
    %c0 = arith.constant 0 : index
    %c0_0 = arith.constant 0 : index
    %c0_1 = arith.constant 0 : index
    %0 = vector.load %arg1[%c0, %c0_0, %c0_1] : memref<1x9x51xf32, #tpu.memory_space<vmem>>, vector<1x9x51xf32>
    %1 = vector.shape_cast %0 : vector<1x9x51xf32> to vector<9x51xf32>
    %c0_2 = arith.constant 0 : index
    %c0_3 = arith.constant 0 : index
    %c0_4 = arith.constant 0 : index
    %2 = vector.load %arg2[%c0_2, %c0_3, %c0_4] : memref<1x9x1xf32, #tpu.memory_space<vmem>>, vector<1x9x1xf32>
    %3 = vector.shape_cast %2 : vector<1x9x1xf32> to vector<9x1xf32>
    %c0_5 = arith.constant 0 : index
    %c0_6 = arith.constant 0 : index
    %4 = vector.load %arg3[%c0_5, %c0_6] : memref<51x3xf32, #tpu.memory_space<vmem>>, vector<51x3xf32>
    %cst = arith.constant dense<0.000000e+00> : vector<9x3xf32>
    %5 = tpu.matmul %1, %4, %cst {dimension_numbers = #tpu.dot_dimension_numbers<[1], [0], [0], [1], [0, 0, 1, 1], [], []>} : vector<9x51xf32>, vector<51x3xf32>, vector<9x3xf32> -> vector<9x3xf32>
    %cst_7 = arith.constant dense<0.000000e+00> : vector<3xf32>
    %6 = vector.multi_reduction <add>, %5, %cst_7 [0] : vector<9x3xf32> to vector<3xf32>
    %7 = vector.shape_cast %6 : vector<3xf32> to vector<1x3xf32>
    %cst_8 = arith.constant dense<0.000000e+00> : vector<1xf32>
    %8 = vector.multi_reduction <add>, %3, %cst_8 [0] : vector<9x1xf32> to vector<1xf32>
    %9 = vector.shape_cast %8 : vector<1xf32> to vector<1x1xf32>
    %10 = vector.broadcast %9 : vector<1x1xf32> to vector<1x3xf32>
    %11 = arith.divf %7, %10 : vector<1x3xf32>
    %c0_9 = arith.constant 0 : index
    %c0_10 = arith.constant 0 : index
    %12 = vector.load %arg4[%c0_9, %c0_10] : memref<3x51xf32, #tpu.memory_space<vmem>>, vector<3x51xf32>
    %cst_11 = arith.constant dense<0.000000e+00> : vector<1x51xf32>
    %13 = tpu.matmul %11, %12, %cst_11 {dimension_numbers = #tpu.dot_dimension_numbers<[1], [0], [0], [1], [0, 0, 1, 1], [], []>} : vector<1x3xf32>, vector<3x51xf32>, vector<1x51xf32> -> vector<1x51xf32>
    %14 = vector.broadcast %13 : vector<1x51xf32> to vector<9x51xf32>
    %15 = arith.subf %1, %14 : vector<9x51xf32>
    %c0_12 = arith.constant 0 : index
    %c0_13 = arith.constant 0 : index
    %16 = vector.load %arg6[%c0_12, %c0_13] : memref<51x48xf32, #tpu.memory_space<vmem>>, vector<51x48xf32>
    %cst_14 = arith.constant dense<0.000000e+00> : vector<9x48xf32>
    %17 = tpu.matmul %15, %16, %cst_14 {dimension_numbers = #tpu.dot_dimension_numbers<[1], [0], [0], [1], [0, 0, 1, 1], [], []>} : vector<9x51xf32>, vector<51x48xf32>, vector<9x48xf32> -> vector<9x48xf32>
    %c0_15 = arith.constant 0 : index
    %c0_16 = arith.constant 0 : index
    %18 = vector.load %arg7[%c0_15, %c0_16] : memref<1x48xf32, #tpu.memory_space<vmem>>, vector<1x48xf32>
    %19 = vector.broadcast %18 : vector<1x48xf32> to vector<9x48xf32>
    %20 = arith.addf %17, %19 : vector<9x48xf32>
    %cst_17 = arith.constant 0.000000e+00 : f32
    %21 = vector.broadcast %cst_17 : f32 to vector<9x48xf32>
    %22 = arith.maximumf %20, %21 : vector<9x48xf32>
    %23 = vector.shape_cast %3 : vector<9x1xf32> to vector<9x1xf32>
    %24 = vector.broadcast %23 : vector<9x1xf32> to vector<9x48xf32>
    %c0_18 = arith.constant 0 : index
    %c0_19 = arith.constant 0 : index
    %25 = vector.load %arg8[%c0_18, %c0_19] : memref<3x9xf32, #tpu.memory_space<vmem>>, vector<3x9xf32>
    %c0_20 = arith.constant 0 : index
    %c0_21 = arith.constant 0 : index
    %26 = vector.load %arg9[%c0_20, %c0_21] : memref<3x9xf32, #tpu.memory_space<vmem>>, vector<3x9xf32>
    %c0_22 = arith.constant 0 : index
    %c0_23 = arith.constant 0 : index
    %27 = vector.load %arg10[%c0_22, %c0_23] : memref<3x9xf32, #tpu.memory_space<vmem>>, vector<3x9xf32>
    %cst_24 = arith.constant dense<0.000000e+00> : vector<3x48xf32>
    %28 = tpu.matmul %26, %22, %cst_24 {dimension_numbers = #tpu.dot_dimension_numbers<[1], [0], [0], [1], [0, 0, 1, 1], [], []>} : vector<3x9xf32>, vector<9x48xf32>, vector<3x48xf32> -> vector<3x48xf32>
    %29 = arith.addf %25, %26 : vector<3x9xf32>
    %30 = arith.addf %29, %27 : vector<3x9xf32>
    %cst_25 = arith.constant dense<0.000000e+00> : vector<3x48xf32>
    %31 = tpu.matmul %30, %24, %cst_25 {dimension_numbers = #tpu.dot_dimension_numbers<[1], [0], [0], [1], [0, 0, 1, 1], [], []>} : vector<3x9xf32>, vector<9x48xf32>, vector<3x48xf32> -> vector<3x48xf32>
    %cst_26 = arith.constant 0.000000e+00 : f32
    %32 = vector.broadcast %cst_26 : f32 to vector<3x48xf32>
    %33 = arith.cmpf one, %31, %32 : vector<3x48xf32>
    %34 = arith.extui %33 : vector<3x48xi1> to vector<3x48xi32>
    %35 = arith.sitofp %34 : vector<3x48xi32> to vector<3x48xf32>
    %cst_27 = arith.constant 9.99999997E-7 : f32
    %36 = vector.broadcast %cst_27 : f32 to vector<3x48xf32>
    %37 = arith.addf %31, %36 : vector<3x48xf32>
    %38 = tpu.reciprocal %37 {approx = true} : vector<3x48xf32> -> vector<3x48xf32>
    %cst_28 = arith.constant 3.000000e+00 : f32
    %39 = vector.broadcast %cst_28 : f32 to vector<3x48xf32>
    %40 = arith.mulf %39, %38 : vector<3x48xf32>
    %41 = arith.mulf %40, %35 : vector<3x48xf32>
    %cst_29 = arith.constant dense<0.000000e+00> : vector<3x48xf32>
    %42 = tpu.matmul %25, %22, %cst_29 {dimension_numbers = #tpu.dot_dimension_numbers<[1], [0], [0], [1], [0, 0, 1, 1], [], []>} : vector<3x9xf32>, vector<9x48xf32>, vector<3x48xf32> -> vector<3x48xf32>
    %c0_30 = arith.constant 0 : index
    %c0_31 = arith.constant 0 : index
    %43 = vector.load %arg11[%c0_30, %c0_31] : memref<48x48xf32, #tpu.memory_space<vmem>>, vector<48x48xf32>
    %cst_32 = arith.constant dense<0.000000e+00> : vector<3x48xf32>
    %44 = tpu.matmul %42, %43, %cst_32 {dimension_numbers = #tpu.dot_dimension_numbers<[1], [0], [0], [1], [0, 0, 1, 1], [], []>} : vector<3x48xf32>, vector<48x48xf32>, vector<3x48xf32> -> vector<3x48xf32>
    %c0_33 = arith.constant 0 : index
    %c0_34 = arith.constant 0 : index
    %45 = vector.load %arg12[%c0_33, %c0_34] : memref<48x48xf32, #tpu.memory_space<vmem>>, vector<48x48xf32>
    %cst_35 = arith.constant dense<0.000000e+00> : vector<3x48xf32>
    %46 = tpu.matmul %28, %45, %cst_35 {dimension_numbers = #tpu.dot_dimension_numbers<[1], [0], [0], [1], [0, 0, 1, 1], [], []>} : vector<3x48xf32>, vector<48x48xf32>, vector<3x48xf32> -> vector<3x48xf32>
    %47 = arith.addf %44, %46 : vector<3x48xf32>
    %cst_36 = arith.constant dense<0.000000e+00> : vector<3x48xf32>
    %48 = tpu.matmul %27, %22, %cst_36 {dimension_numbers = #tpu.dot_dimension_numbers<[1], [0], [0], [1], [0, 0, 1, 1], [], []>} : vector<3x9xf32>, vector<9x48xf32>, vector<3x48xf32> -> vector<3x48xf32>
    %c0_37 = arith.constant 0 : index
    %c0_38 = arith.constant 0 : index
    %49 = vector.load %arg13[%c0_37, %c0_38] : memref<48x48xf32, #tpu.memory_space<vmem>>, vector<48x48xf32>
    %cst_39 = arith.constant dense<0.000000e+00> : vector<3x48xf32>
    %50 = tpu.matmul %48, %49, %cst_39 {dimension_numbers = #tpu.dot_dimension_numbers<[1], [0], [0], [1], [0, 0, 1, 1], [], []>} : vector<3x48xf32>, vector<48x48xf32>, vector<3x48xf32> -> vector<3x48xf32>
    %51 = arith.addf %47, %50 : vector<3x48xf32>
    %52 = arith.mulf %51, %41 : vector<3x48xf32>
    %c0_40 = arith.constant 0 : index
    %c0_41 = arith.constant 0 : index
    %53 = vector.load %arg14[%c0_40, %c0_41] : memref<1x48xf32, #tpu.memory_space<vmem>>, vector<1x48xf32>
    %54 = vector.broadcast %53 : vector<1x48xf32> to vector<3x48xf32>
    %55 = arith.addf %52, %54 : vector<3x48xf32>
    %cst_42 = arith.constant 0.000000e+00 : f32
    %56 = vector.broadcast %cst_42 : f32 to vector<3x48xf32>
    %57 = arith.maximumf %55, %56 : vector<3x48xf32>
    %c0_43 = arith.constant 0 : index
    %c0_44 = arith.constant 0 : index
    %58 = vector.load %arg15[%c0_43, %c0_44] : memref<48x48xf32, #tpu.memory_space<vmem>>, vector<48x48xf32>
    %cst_45 = arith.constant dense<0.000000e+00> : vector<3x48xf32>
    %59 = tpu.matmul %57, %58, %cst_45 {dimension_numbers = #tpu.dot_dimension_numbers<[1], [0], [0], [1], [0, 0, 1, 1], [], []>} : vector<3x48xf32>, vector<48x48xf32>, vector<3x48xf32> -> vector<3x48xf32>
    %c0_46 = arith.constant 0 : index
    %c0_47 = arith.constant 0 : index
    %60 = vector.load %arg16[%c0_46, %c0_47] : memref<1x48xf32, #tpu.memory_space<vmem>>, vector<1x48xf32>
    %61 = vector.broadcast %60 : vector<1x48xf32> to vector<3x48xf32>
    %62 = arith.addf %59, %61 : vector<3x48xf32>
    %cst_48 = arith.constant 0.000000e+00 : f32
    %63 = vector.broadcast %cst_48 : f32 to vector<3x48xf32>
    %64 = arith.maximumf %62, %63 : vector<3x48xf32>
    %65 = arith.addf %64, %28 : vector<3x48xf32>
    %c0_49 = arith.constant 0 : index
    %c0_50 = arith.constant 0 : index
    %66 = vector.load %arg17[%c0_49, %c0_50] : memref<1x3xf32, #tpu.memory_space<vmem>>, vector<1x3xf32>
    %c0_51 = arith.constant 0 : index
    %c0_52 = arith.constant 0 : index
    %67 = vector.load %arg18[%c0_51, %c0_52] : memref<1x3xf32, #tpu.memory_space<vmem>>, vector<1x3xf32>
    %c0_53 = arith.constant 0 : index
    %c0_54 = arith.constant 0 : index
    %68 = vector.load %arg19[%c0_53, %c0_54] : memref<1x3xf32, #tpu.memory_space<vmem>>, vector<1x3xf32>
    %cst_55 = arith.constant dense<0.000000e+00> : vector<1x48xf32>
    %69 = tpu.matmul %67, %65, %cst_55 {dimension_numbers = #tpu.dot_dimension_numbers<[1], [0], [0], [1], [0, 0, 1, 1], [], []>} : vector<1x3xf32>, vector<3x48xf32>, vector<1x48xf32> -> vector<1x48xf32>
    %70 = arith.addf %66, %67 : vector<1x3xf32>
    %71 = arith.addf %70, %68 : vector<1x3xf32>
    %cst_56 = arith.constant dense<0.000000e+00> : vector<1x48xf32>
    %72 = tpu.matmul %71, %35, %cst_56 {dimension_numbers = #tpu.dot_dimension_numbers<[1], [0], [0], [1], [0, 0, 1, 1], [], []>} : vector<1x3xf32>, vector<3x48xf32>, vector<1x48xf32> -> vector<1x48xf32>
    %cst_57 = arith.constant 0.000000e+00 : f32
    %73 = vector.broadcast %cst_57 : f32 to vector<1x48xf32>
    %74 = arith.cmpf one, %72, %73 : vector<1x48xf32>
    %75 = arith.extui %74 : vector<1x48xi1> to vector<1x48xi32>
    %76 = arith.sitofp %75 : vector<1x48xi32> to vector<1x48xf32>
    %cst_58 = arith.constant 9.99999997E-7 : f32
    %77 = vector.broadcast %cst_58 : f32 to vector<1x48xf32>
    %78 = arith.addf %72, %77 : vector<1x48xf32>
    %79 = tpu.reciprocal %78 {approx = true} : vector<1x48xf32> -> vector<1x48xf32>
    %cst_59 = arith.constant 3.000000e+00 : f32
    %80 = vector.broadcast %cst_59 : f32 to vector<1x48xf32>
    %81 = arith.mulf %80, %79 : vector<1x48xf32>
    %82 = arith.mulf %81, %76 : vector<1x48xf32>
    %cst_60 = arith.constant dense<0.000000e+00> : vector<1x48xf32>
    %83 = tpu.matmul %66, %65, %cst_60 {dimension_numbers = #tpu.dot_dimension_numbers<[1], [0], [0], [1], [0, 0, 1, 1], [], []>} : vector<1x3xf32>, vector<3x48xf32>, vector<1x48xf32> -> vector<1x48xf32>
    %c0_61 = arith.constant 0 : index
    %c0_62 = arith.constant 0 : index
    %84 = vector.load %arg20[%c0_61, %c0_62] : memref<48x48xf32, #tpu.memory_space<vmem>>, vector<48x48xf32>
    %cst_63 = arith.constant dense<0.000000e+00> : vector<1x48xf32>
    %85 = tpu.matmul %83, %84, %cst_63 {dimension_numbers = #tpu.dot_dimension_numbers<[1], [0], [0], [1], [0, 0, 1, 1], [], []>} : vector<1x48xf32>, vector<48x48xf32>, vector<1x48xf32> -> vector<1x48xf32>
    %c0_64 = arith.constant 0 : index
    %c0_65 = arith.constant 0 : index
    %86 = vector.load %arg21[%c0_64, %c0_65] : memref<48x48xf32, #tpu.memory_space<vmem>>, vector<48x48xf32>
    %cst_66 = arith.constant dense<0.000000e+00> : vector<1x48xf32>
    %87 = tpu.matmul %69, %86, %cst_66 {dimension_numbers = #tpu.dot_dimension_numbers<[1], [0], [0], [1], [0, 0, 1, 1], [], []>} : vector<1x48xf32>, vector<48x48xf32>, vector<1x48xf32> -> vector<1x48xf32>
    %88 = arith.addf %85, %87 : vector<1x48xf32>
    %cst_67 = arith.constant dense<0.000000e+00> : vector<1x48xf32>
    %89 = tpu.matmul %68, %65, %cst_67 {dimension_numbers = #tpu.dot_dimension_numbers<[1], [0], [0], [1], [0, 0, 1, 1], [], []>} : vector<1x3xf32>, vector<3x48xf32>, vector<1x48xf32> -> vector<1x48xf32>
    %c0_68 = arith.constant 0 : index
    %c0_69 = arith.constant 0 : index
    %90 = vector.load %arg22[%c0_68, %c0_69] : memref<48x48xf32, #tpu.memory_space<vmem>>, vector<48x48xf32>
    %cst_70 = arith.constant dense<0.000000e+00> : vector<1x48xf32>
    %91 = tpu.matmul %89, %90, %cst_70 {dimension_numbers = #tpu.dot_dimension_numbers<[1], [0], [0], [1], [0, 0, 1, 1], [], []>} : vector<1x48xf32>, vector<48x48xf32>, vector<1x48xf32> -> vector<1x48xf32>
    %92 = arith.addf %88, %91 : vector<1x48xf32>
    %93 = arith.mulf %92, %82 : vector<1x48xf32>
    %c0_71 = arith.constant 0 : index
    %c0_72 = arith.constant 0 : index
    %94 = vector.load %arg23[%c0_71, %c0_72] : memref<1x48xf32, #tpu.memory_space<vmem>>, vector<1x48xf32>
    %95 = arith.addf %93, %94 : vector<1x48xf32>
    %cst_73 = arith.constant 0.000000e+00 : f32
    %96 = vector.broadcast %cst_73 : f32 to vector<1x48xf32>
    %97 = arith.maximumf %95, %96 : vector<1x48xf32>
    %c0_74 = arith.constant 0 : index
    %c0_75 = arith.constant 0 : index
    %98 = vector.load %arg24[%c0_74, %c0_75] : memref<48x48xf32, #tpu.memory_space<vmem>>, vector<48x48xf32>
    %cst_76 = arith.constant dense<0.000000e+00> : vector<1x48xf32>
    %99 = tpu.matmul %97, %98, %cst_76 {dimension_numbers = #tpu.dot_dimension_numbers<[1], [0], [0], [1], [0, 0, 1, 1], [], []>} : vector<1x48xf32>, vector<48x48xf32>, vector<1x48xf32> -> vector<1x48xf32>
    %c0_77 = arith.constant 0 : index
    %c0_78 = arith.constant 0 : index
    %100 = vector.load %arg25[%c0_77, %c0_78] : memref<1x48xf32, #tpu.memory_space<vmem>>, vector<1x48xf32>
    %101 = arith.addf %99, %100 : vector<1x48xf32>
    %cst_79 = arith.constant 0.000000e+00 : f32
    %102 = vector.broadcast %cst_79 : f32 to vector<1x48xf32>
    %103 = arith.maximumf %101, %102 : vector<1x48xf32>
    %104 = arith.addf %103, %69 : vector<1x48xf32>
    %c0_80 = arith.constant 0 : index
    %c0_81 = arith.constant 0 : index
    %105 = vector.load %arg26[%c0_80, %c0_81] : memref<48x48xf32, #tpu.memory_space<vmem>>, vector<48x48xf32>
    %cst_82 = arith.constant dense<0.000000e+00> : vector<1x48xf32>
    %106 = tpu.matmul %104, %105, %cst_82 {dimension_numbers = #tpu.dot_dimension_numbers<[1], [0], [0], [1], [0, 0, 1, 1], [], []>} : vector<1x48xf32>, vector<48x48xf32>, vector<1x48xf32> -> vector<1x48xf32>
    %c0_83 = arith.constant 0 : index
    %c0_84 = arith.constant 0 : index
    %107 = vector.load %arg27[%c0_83, %c0_84] : memref<1x48xf32, #tpu.memory_space<vmem>>, vector<1x48xf32>
    %108 = arith.addf %106, %107 : vector<1x48xf32>
    %cst_85 = arith.constant 0.000000e+00 : f32
    %109 = vector.broadcast %cst_85 : f32 to vector<1x48xf32>
    %110 = arith.maximumf %108, %109 : vector<1x48xf32>
    %c0_86 = arith.constant 0 : index
    %c0_87 = arith.constant 0 : index
    %111 = vector.load %arg28[%c0_86, %c0_87] : memref<48x51xf32, #tpu.memory_space<vmem>>, vector<48x51xf32>
    %cst_88 = arith.constant dense<0.000000e+00> : vector<1x51xf32>
    %112 = tpu.matmul %110, %111, %cst_88 {dimension_numbers = #tpu.dot_dimension_numbers<[1], [0], [0], [1], [0, 0, 1, 1], [], []>} : vector<1x48xf32>, vector<48x51xf32>, vector<1x51xf32> -> vector<1x51xf32>
    %c0_89 = arith.constant 0 : index
    %c0_90 = arith.constant 0 : index
    %113 = vector.load %arg29[%c0_89, %c0_90] : memref<1x51xf32, #tpu.memory_space<vmem>>, vector<1x51xf32>
    %114 = arith.addf %112, %113 : vector<1x51xf32>
    %c0_91 = arith.constant 0 : index
    %c0_92 = arith.constant 0 : index
    %115 = vector.load %arg5[%c0_91, %c0_92] : memref<3x51xf32, #tpu.memory_space<vmem>>, vector<3x51xf32>
    %cst_93 = arith.constant dense<0.000000e+00> : vector<1x51xf32>
    %116 = tpu.matmul %11, %115, %cst_93 {dimension_numbers = #tpu.dot_dimension_numbers<[1], [0], [0], [1], [0, 0, 1, 1], [], []>} : vector<1x3xf32>, vector<3x51xf32>, vector<1x51xf32> -> vector<1x51xf32>
    %117 = arith.addf %114, %116 : vector<1x51xf32>
    %c0_94 = arith.constant 0 : index
    %c0_95 = arith.constant 0 : index
    %c0_96 = arith.constant 0 : index
    %118 = vector.load %arg30[%c0_94, %c0_95, %c0_96] : memref<1x1x51xf32, #tpu.memory_space<vmem>>, vector<1x1x51xf32>
    %119 = vector.shape_cast %118 : vector<1x1x51xf32> to vector<1x51xf32>
    %120 = vector.shape_cast %117 : vector<1x51xf32> to vector<1x1x51xf32>
    tpu.vector_store %arg30[%c0_94, %c0_95, %c0_96], %120 {strides = array<i32>} : memref<1x1x51xf32, #tpu.memory_space<vmem>>, vector<1x1x51xf32>,
    return
  }
  func.func @transform_0(%arg0: i32) -> (i32, i32, i32) {
    %c0_i32 = arith.constant 0 : i32
    %c0_i32_0 = arith.constant 0 : i32
    %c0_i32_1 = arith.constant 0 : i32
    return %arg0, %c0_i32, %c0_i32_0 : i32, i32, i32
  }
  func.func @transform_1(%arg0: i32) -> (i32, i32, i32) {
    %c0_i32 = arith.constant 0 : i32
    %c0_i32_0 = arith.constant 0 : i32
    %c0_i32_1 = arith.constant 0 : i32
    return %arg0, %c0_i32, %c0_i32_0 : i32, i32, i32
  }
  func.func @transform_2(%arg0: i32) -> (i32, i32) {
    %c0_i32 = arith.constant 0 : i32
    %c0_i32_0 = arith.constant 0 : i32
    %c0_i32_1 = arith.constant 0 : i32
    return %c0_i32, %c0_i32_0 : i32, i32
  }
  func.func @transform_3(%arg0: i32) -> (i32, i32) {
    %c0_i32 = arith.constant 0 : i32
    %c0_i32_0 = arith.constant 0 : i32
    %c0_i32_1 = arith.constant 0 : i32
    return %c0_i32, %c0_i32_0 : i32, i32
  }
  func.func @transform_4(%arg0: i32) -> (i32, i32) {
    %c0_i32 = arith.constant 0 : i32
    %c0_i32_0 = arith.constant 0 : i32
    %c0_i32_1 = arith.constant 0 : i32
    return %c0_i32, %c0_i32_0 : i32, i32
  }
  func.func @transform_5(%arg0: i32) -> (i32, i32) {
    %c0_i32 = arith.constant 0 : i32
    %c0_i32_0 = arith.constant 0 : i32
    %c0_i32_1 = arith.constant 0 : i32
    return %c0_i32, %c0_i32_0 : i32, i32
  }
  func.func @transform_6(%arg0: i32) -> (i32, i32) {
    %c0_i32 = arith.constant 0 : i32
    %c0_i32_0 = arith.constant 0 : i32
    %c0_i32_1 = arith.constant 0 : i32
    return %c0_i32, %c0_i32_0 : i32, i32
  }
  func.func @transform_7(%arg0: i32) -> (i32, i32) {
    %c0_i32 = arith.constant 0 : i32
    %c0_i32_0 = arith.constant 0 : i32
    %c0_i32_1 = arith.constant 0 : i32
    return %c0_i32, %c0_i32_0 : i32, i32
  }
  func.func @transform_8(%arg0: i32) -> (i32, i32) {
    %c0_i32 = arith.constant 0 : i32
    %c0_i32_0 = arith.constant 0 : i32
    %c0_i32_1 = arith.constant 0 : i32
    return %c0_i32, %c0_i32_0 : i32, i32
  }
  func.func @transform_9(%arg0: i32) -> (i32, i32) {
    %c0_i32 = arith.constant 0 : i32
    %c0_i32_0 = arith.constant 0 : i32
    %c0_i32_1 = arith.constant 0 : i32
    return %c0_i32, %c0_i32_0 : i32, i32
  }
  func.func @transform_10(%arg0: i32) -> (i32, i32) {
    %c0_i32 = arith.constant 0 : i32
    %c0_i32_0 = arith.constant 0 : i32
    %c0_i32_1 = arith.constant 0 : i32
    return %c0_i32, %c0_i32_0 : i32, i32
  }
  func.func @transform_11(%arg0: i32) -> (i32, i32) {
    %c0_i32 = arith.constant 0 : i32
    %c0_i32_0 = arith.constant 0 : i32
    %c0_i32_1 = arith.constant 0 : i32
    return %c0_i32, %c0_i32_0 : i32, i32
  }
  func.func @transform_12(%arg0: i32) -> (i32, i32) {
    %c0_i32 = arith.constant 0 : i32
    %c0_i32_0 = arith.constant 0 : i32
    %c0_i32_1 = arith.constant 0 : i32
    return %c0_i32, %c0_i32_0 : i32, i32
  }
  func.func @transform_13(%arg0: i32) -> (i32, i32) {
    %c0_i32 = arith.constant 0 : i32
    %c0_i32_0 = arith.constant 0 : i32
    %c0_i32_1 = arith.constant 0 : i32
    return %c0_i32, %c0_i32_0 : i32, i32
  }
  func.func @transform_14(%arg0: i32) -> (i32, i32) {
    %c0_i32 = arith.constant 0 : i32
    %c0_i32_0 = arith.constant 0 : i32
    %c0_i32_1 = arith.constant 0 : i32
    return %c0_i32, %c0_i32_0 : i32, i32
  }
  func.func @transform_15(%arg0: i32) -> (i32, i32) {
    %c0_i32 = arith.constant 0 : i32
    %c0_i32_0 = arith.constant 0 : i32
    %c0_i32_1 = arith.constant 0 : i32
    return %c0_i32, %c0_i32_0 : i32, i32
  }
  func.func @transform_16(%arg0: i32) -> (i32, i32) {
    %c0_i32 = arith.constant 0 : i32
    %c0_i32_0 = arith.constant 0 : i32
    %c0_i32_1 = arith.constant 0 : i32
    return %c0_i32, %c0_i32_0 : i32, i32
  }
  func.func @transform_17(%arg0: i32) -> (i32, i32) {
    %c0_i32 = arith.constant 0 : i32
    %c0_i32_0 = arith.constant 0 : i32
    %c0_i32_1 = arith.constant 0 : i32
    return %c0_i32, %c0_i32_0 : i32, i32
  }
  func.func @transform_18(%arg0: i32) -> (i32, i32) {
    %c0_i32 = arith.constant 0 : i32
    %c0_i32_0 = arith.constant 0 : i32
    %c0_i32_1 = arith.constant 0 : i32
    return %c0_i32, %c0_i32_0 : i32, i32
  }
  func.func @transform_19(%arg0: i32) -> (i32, i32) {
    %c0_i32 = arith.constant 0 : i32
    %c0_i32_0 = arith.constant 0 : i32
    %c0_i32_1 = arith.constant 0 : i32
    return %c0_i32, %c0_i32_0 : i32, i32
  }
  func.func @transform_20(%arg0: i32) -> (i32, i32) {
    %c0_i32 = arith.constant 0 : i32
    %c0_i32_0 = arith.constant 0 : i32
    %c0_i32_1 = arith.constant 0 : i32
    return %c0_i32, %c0_i32_0 : i32, i32
  }
  func.func @transform_21(%arg0: i32) -> (i32, i32) {
    %c0_i32 = arith.constant 0 : i32
    %c0_i32_0 = arith.constant 0 : i32
    %c0_i32_1 = arith.constant 0 : i32
    return %c0_i32, %c0_i32_0 : i32, i32
  }
  func.func @transform_22(%arg0: i32) -> (i32, i32) {
    %c0_i32 = arith.constant 0 : i32
    %c0_i32_0 = arith.constant 0 : i32
    %c0_i32_1 = arith.constant 0 : i32
    return %c0_i32, %c0_i32_0 : i32, i32
  }
  func.func @transform_23(%arg0: i32) -> (i32, i32) {
    %c0_i32 = arith.constant 0 : i32
    %c0_i32_0 = arith.constant 0 : i32
    %c0_i32_1 = arith.constant 0 : i32
    return %c0_i32, %c0_i32_0 : i32, i32
  }
  func.func @transform_24(%arg0: i32) -> (i32, i32) {
    %c0_i32 = arith.constant 0 : i32
    %c0_i32_0 = arith.constant 0 : i32
    %c0_i32_1 = arith.constant 0 : i32
    return %c0_i32, %c0_i32_0 : i32, i32
  }
  func.func @transform_25(%arg0: i32) -> (i32, i32) {
    %c0_i32 = arith.constant 0 : i32
    %c0_i32_0 = arith.constant 0 : i32
    %c0_i32_1 = arith.constant 0 : i32
    return %c0_i32, %c0_i32_0 : i32, i32
  }
  func.func @transform_26(%arg0: i32) -> (i32, i32) {
    %c0_i32 = arith.constant 0 : i32
    %c0_i32_0 = arith.constant 0 : i32
    %c0_i32_1 = arith.constant 0 : i32
    return %c0_i32, %c0_i32_0 : i32, i32
  }
  func.func @transform_27(%arg0: i32) -> (i32, i32) {
    %c0_i32 = arith.constant 0 : i32
    %c0_i32_0 = arith.constant 0 : i32
    %c0_i32_1 = arith.constant 0 : i32
    return %c0_i32, %c0_i32_0 : i32, i32
  }
  func.func @transform_28(%arg0: i32) -> (i32, i32) {
    %c0_i32 = arith.constant 0 : i32
    %c0_i32_0 = arith.constant 0 : i32
    %c0_i32_1 = arith.constant 0 : i32
    return %c0_i32, %c0_i32_0 : i32, i32
  }
  func.func @transform_29(%arg0: i32) -> (i32, i32, i32) {
    %c0_i32 = arith.constant 0 : i32
    %c0_i32_0 = arith.constant 0 : i32
    %c0_i32_1 = arith.constant 0 : i32
    return %arg0, %c0_i32, %c0_i32_0 : i32, i32, i32
  }
}

</mosaic_0001>

<bundles_post_ra>
// kernel: tpu_custom_call.1
= control target key start
LH: loop header
LB: loop body
LE: loop exit
PB: predicated region body
PF: predicated region fallthrough
CT: control target
= control target key end

     0   :  { %s4541_s6 = smov 1   ;;  %s4542_s10 = smov 2   ;;  %s5274_s0 = inlined_call_operand.smem [shape: u32[30], index: -1, kind: input, shape index: {}] }
   0x1   :  { %s4601_s5 = sld [smem:[%s5274_s0]]   ;;  %s4543_s14 = smov 3  }
   0x2   :  { %s4606_s9 = sld [smem:[%s5274_s0 + %s4541_s6]]   ;;  %s4544_s18 = smov 4  }
   0x3   :  { %s4611_s13 = sld [smem:[%s5274_s0 + %s4542_s10]]   ;;  %s4545_s22 = smov 5  }
   0x4   :  { %s4616_s17 = sld [smem:[%s5274_s0 + %s4543_s14]]   ;;  %s4546_s26 = smov 6  }
   0x5   :  { %s4621_s21 = sld [smem:[%s5274_s0 + %s4544_s18]]   ;;  %s4547_s30 = smov 7  }
   0x6   :  { %s4626_s25 = sld [smem:[%s5274_s0 + %s4545_s22]]   ;;  %s4548_s4 = smov 8  }
   0x7   :  { %5300 = sst [smem:[#allocation36_spill]] %s4601_s5  ;;  %s4549_s10 = smov 9  }
   0x8   :  { %5301 = sst [smem:[#allocation37_spill]] %s4606_s9  ;;  %s4550_s15 = smov 10  }
   0x9   :  { %5302 = sst [smem:[#allocation38_spill]] %s4611_s13  ;;  %s4551_s20 = smov 11  }
   0xa   :  { %s4631_s29 = sld [smem:[%s5274_s0 + %s4546_s26]]   ;;  %s4552_s26 = smov 12  }
   0xb   :  { %5303 = sst [smem:[#allocation39_spill]] %s4621_s21  ;;  %s4553_s1 = smov 13  }
   0xc   :  { %5304 = sst [smem:[#allocation40_spill]] %s4626_s25  ;;  %s4554_s7 = smov 14  }
   0xd   :  { %s4636_s3 = sld [smem:[%s5274_s0 + %s4547_s30]]   ;;  %s4556_s22 = smov 16  }
   0xe   :  { %s4641_s8 = sld [smem:[%s5274_s0 + %s4548_s4]]   ;;  %s4557_s28 = smov 17  }
   0xf   :  { %s4646_s14 = sld [smem:[%s5274_s0 + %s4549_s10]]  }
  0x10   :  { %5305 = sst [smem:[#allocation41_spill]] %s4631_s29 }
  0x11   :  { %s4651_s19 = sld [smem:[%s5274_s0 + %s4550_s15]]   ;;  %s4555_s15 = smov 15  }
  0x12   :  { %s4656_s24 = sld [smem:[%s5274_s0 + %s4551_s20]]  }
  0x13   :  { %5306 = sst [smem:[#allocation42_spill]] %s4636_s3 }
  0x14   :  { %5307 = sst [smem:[#allocation43_spill]] %s4641_s8 }
  0x15   :  { %s4661_s30 = sld [smem:[%s5274_s0 + %s4552_s26]]  }
  0x16   :  { %s4666_s6 = sld [smem:[%s5274_s0 + %s4553_s1]]  }
  0x17   :  { %5308 = sst [smem:[#allocation44_spill]] %s4651_s19 }
  0x18   :  { %5309 = sst [smem:[#allocation45_spill]] %s4656_s24 }
  0x19   :  { %s4671_s12 = sld [smem:[%s5274_s0 + %s4554_s7]]   ;;  %s4558_s7 = smov 18  }
  0x1a   :  { %s4676_s20 = sld [smem:[%s5274_s0 + %s4555_s15]]   ;;  %s4559_s15 = smov 19  }
  0x1b   :  { %5310 = sst [smem:[#allocation46_spill]] %s4661_s30 }
  0x1c   :  { %5311 = sst [smem:[#allocation47_spill]] %s4666_s6 }
  0x1d   :  { %s4681_s27 = sld [smem:[%s5274_s0 + %s4556_s22]]   ;;  %s4560_s22 = smov 20  }
  0x1e   :  { %s4686_s4 = sld [smem:[%s5274_s0 + %s4557_s28]]   ;;  %s4561_s28 = smov 21  }
  0x1f   :  { %5312 = sst [smem:[#allocation48_spill]] %s4671_s12 }
  0x20   :  { %s4691_s6 = sld [smem:[%s5274_s0 + %s4558_s7]]   ;;  %s4562_s7 = smov 22  }
  0x21   :  { %s4696_s30 = sld [smem:[%s5274_s0 + %s4559_s15]]   ;;  %s4563_s15 = smov 23  }
  0x22   :  { %s4701_s19 = sld [smem:[%s5274_s0 + %s4560_s22]]   ;;  %s4564_s22 = smov 24  }
  0x23   :  { %s4706_s12 = sld [smem:[%s5274_s0 + %s4561_s28]]   ;;  %s4565_s28 = smov 25  }
  0x24   :  { %5313 = sst [smem:[#allocation49_spill]] %s4686_s4 }
  0x25   :  { %s4711_s29 = sld [smem:[%s5274_s0 + %s4562_s7]]   ;;  %s4566_s7 = smov 26  }
  0x26   :  { %s4721_s24 = sld [smem:[%s5274_s0 + %s4564_s22]]   ;;  %s4568_s22 = smov 28  }
  0x27   :  { %5314 = sst [smem:[#allocation50_spill]] %s4696_s30 }
  0x28   :  { %s4716_s30 = sld [smem:[%s5274_s0 + %s4563_s15]]   ;;  %s4567_s15 = smov 27  }
  0x29   :  { %s4726_s25 = sld [smem:[%s5274_s0 + %s4565_s28]]   ;;  %s4569_s28 = smov 29  }
  0x2a   :  { %s4731_s9 = sld [smem:[%s5274_s0 + %s4566_s7]]  }
  0x2b   :  { %s4736_s13 = sld [smem:[%s5274_s0 + %s4567_s15]]  }
  0x2c   :  { %s4741_s5 = sld [smem:[%s5274_s0 + %s4568_s22]]  }
  0x2f   :  { %5315 = sst [smem:[#allocation51_spill]] %s4726_s25 }
  0x30   :  { %s4746_s25 = sld [smem:[%s5274_s0 + %s4569_s28]]  }
  0x32   :  { %5316 = sst [smem:[#allocation52_spill]] %s4741_s5 }
  0x33   :  { %64 = vsyncpa [#allocation3], 0 }
  0x34   :  { %65 = vsyncpa [#allocation6], 0 }
  0x35   :  { %66 = vsyncpa [#allocation9], 0 }
  0x36   :  { %67 = vsyncpa [#allocation12], 0 }
  0x37   :  { %68 = vsyncpa [#allocation15], 0 }
  0x38   :  { %69 = vsyncpa [#allocation18], 0 }
  0x39   :  { %70 = vsyncpa [#allocation21], 0 }
  0x3a   :  { %71 = vsyncpa [#allocation24], 0 }
  0x3b   :  { %72 = vsyncpa [#allocation4], 0 }
  0x3c   :  { %74 = vsyncpa [#allocation4 + $0x1], 0  ;;  %s4748_s7 = smov 0   ;;  %s4750_s10 = smov 0  }
  0x3d   :  { %s4752_s11 = smov 0   ;;  %s4754_s15 = smov 0  }
  0x3e LB: > { %s5317_s3 = sld [smem:[#allocation42_spill]]  ;;  %s5318_s4 = sld [smem:[#allocation49_spill]]  ;;  %s4539_s15 = sphi %s4754_s15, %s5369_s15   ;;  %s4535_s11 = sphi %s4752_s11, %s5371_s11   ;;  %s4531_s10 = sphi %s4750_s10, %s5373_s10   ;;  %s4527_s7 = sphi %s4748_s7, %s5372_s7  }
  0x3f   : > { %s5319_s21 = sld [smem:[#allocation39_spill]]  ;;  %s5320_s8 = sld [smem:[#allocation43_spill]] }
  0x40   : > { %5321 = sst [smem:[#allocation53_spill]] %s4527_s7  ;;  %s4769_s0 = sadd.s32 4294967295, %s4539_s15  }
  0x41   : > { %5322 = sst [smem:[#allocation54_spill]] %s4535_s11  ;;  %s3208_s16 = sadd.s32 4294967294, %s4539_s15  }
  0x42   : > { %s4773_s18 = sadd.s32 1, %s4539_s15   ;;  %s706_s22 = sadd.s32 1, %s4535_s11 }
  0x43   : > { %5323 = sst [smem:[#allocation55_spill]] %s4773_s18  ;;  %s703_s23 = ssub.s32 %s4539_s15, %s4773_s18 }
  0x44   : > { %p716_p0 = scmp.ne.s32.totalorder %s4535_s11, %s4531_s10  ;;  %p704_p1 = scmp.eq.s32.totalorder %s703_s23, 0 }
  0x45   : > { %p717_p2 = scmp.eq.s32.totalorder %s4769_s0, 1  ;;  %p722_p3 = scmp.ne.s32.totalorder %s4531_s10, %s4527_s7 }
  0x46   : > { %p723_p4 = scmp.eq.s32.totalorder %s3208_s16, 1  ;;  %p3209_p7 = scmp.ge.s32.totalorder %s4539_s15, 1 }
  0x47   : > { %s4784_s26 = scalar_select %p704_p1, %s4535_s11, %s706_s22  }
  0x48   : > { %p4786_p5 = por %p717_p2, %p716_p0  ;;  %p4790_p6 = por %p723_p4, %p722_p3 }
  0x49   : > { %5324 = sst [smem:[#allocation56_spill]] %s4784_s26  ;;  %p730_p8 = scmp.lt.s32.totalorder %s4539_s15, 3 }
  0x4a   : > { %s5325_s28 = scalar_select %p4786_p5, 1, 0 }
  0x4b   : > { %s5326_s1 = scalar_select %p4790_p6, 1, 0 }
  0x4c   : > { %p5288_p9 = scmp.eq.s32.totalorder %s4769_s0, 0  ;;  %p4797_p10 = pnand %p3209_p7, %p730_p8 }
  0x4d   : > { %5327 = sst [smem:[#allocation57_spill]] %s5326_s1  ;;  %s4570_s16 = smov [#allocation5]  }
  0x4e   : > { %s5328_s2 = scalar_select %p4797_p10, 1, 0 }
  0x4f   : > { %s757_s22 = sshll.u32 %s4570_s16, 4  ;;  %p3849_p11 = pneg %p4797_p10  ;;  %s758_s22 = int_to_ptr.vmem [resolvable:$true] %s757_s22 }
  0x50   : > { %s4571_s23 = smov [#allocation8]   ;;  %s4572_s18 = smov [#allocation11]  }
  0x51   : > { %s785_s26 = sshll.u32 %s4571_s23, 4  ;;  %p4805_p12 = pnand %p5288_p9, %p3849_p11  ;;  %s4809_s26 = int_to_ptr.vmem [resolvable:$true] %s785_s26 }
  0x52   : > { %s822_s1 = sshll.u32 %s4572_s18, 4  ;;  %s4025_s7 = scalar_lea.hbm %s5319_s21, 64  ;;  %s4811_s1 = int_to_ptr.vmem [resolvable:$true] %s822_s1 }
  0x53   : > { %p4026_p13 = scmp.ne.s32.totalorder %s5319_s21, %s4025_s7  ;;  %p4817_p0 = pneg %p4805_p12 }
  0x54   : > { %p4032_p3 = scmp.lt.u32.totalorder %s4025_s7, %s5319_s21 }
  0x55   : > { %p4028_p1 = pnand %p4817_p0, %p4026_p13 }
  0x57   : > { %p4029_p2 = pneg %p4028_p1 }
  0x59   : > { %p4034_p4 = pnand %p4032_p3, %p4029_p2 }
  0x5b   : > { %4037 = shalt.err (!%p4034_p4)
}
  0x5c   : > { %s4038_s23 = scalar_lea.vmem %s758_s22, 64  ;;  %p4046_p9 = scmp.lt.s32.totalorder %s758_s22, %s758_s22 }
  0x5d   : > { %p4039_p7 = scmp.ne.s32.totalorder %s758_s22, %s4038_s23  ;;  %p4047_p6 = scmp.lt.s32.totalorder %s4038_s23, %s4038_s23 }
  0x5f   : > { %p4041_p8 = pnand %p4039_p7, %p4817_p0  ;;  %p4048_p5 = por %p4047_p6, %p4046_p9 }
  0x61   : > { %p4042_p11 = pneg %p4041_p8 }
  0x63   : > { %p4049_p10 = pnand %p4048_p5, %p4042_p11 }
  0x65   : > { %4052 = shalt.err (!%p4049_p10)
}
  0x66   : > { %3855 = dma.hbm_to_vmem [thread:$0]  (!%p4805_p12), %s5319_s21, 64, %s758_s22, [#allocation6]  }
  0x67   : > { %s4053_s7 = scalar_lea.hbm %s5320_s8, 64 }
  0x68   : > { %p4054_p13 = scmp.ne.s32.totalorder %s5320_s8, %s4053_s7  ;;  %p4060_p3 = scmp.lt.u32.totalorder %s4053_s7, %s5320_s8 }
  0x6a   : > { %p4056_p1 = pnand %p4054_p13, %p4817_p0 }
  0x6c   : > { %p4057_p2 = pneg %p4056_p1 }
  0x6e   : > { %p4062_p4 = pnand %p4060_p3, %p4057_p2 }
  0x70   : > { %4065 = shalt.err (!%p4062_p4)
}
  0x71   : > { %s4066_s18 = scalar_lea.vmem %s4809_s26, 64  ;;  %p4074_p10 = scmp.lt.s32.totalorder %s4809_s26, %s4809_s26 }
  0x72   : > { %p4067_p5 = scmp.ne.s32.totalorder %s4809_s26, %s4066_s18  ;;  %p4075_p7 = scmp.lt.s32.totalorder %s4066_s18, %s4066_s18 }
  0x74   : > { %p4069_p6 = pnand %p4067_p5, %p4817_p0  ;;  %p4076_p8 = por %p4075_p7, %p4074_p10 }
  0x76   : > { %p4070_p9 = pneg %p4069_p6 }
  0x78   : > { %p4077_p11 = pnand %p4076_p8, %p4070_p9 }
  0x7a   : > { %4080 = shalt.err (!%p4077_p11)
}
  0x7b   : > { %3861 = dma.hbm_to_vmem [thread:$0]  (!%p4805_p12), %s5320_s8, 64, %s4809_s26, [#allocation9]  }
  0x7c   : > { %s4081_s22 = scalar_lea.hbm %s4676_s20, 16 }
  0x7d   : > { %p4082_p13 = scmp.ne.s32.totalorder %s4676_s20, %s4081_s22  ;;  %p4088_p3 = scmp.lt.u32.totalorder %s4081_s22, %s4676_s20 }
  0x7f   : > { %p4084_p1 = pnand %p4082_p13, %p4817_p0 }
  0x81   : > { %p4085_p2 = pneg %p4084_p1 }
  0x83   : > { %p4090_p4 = pnand %p4088_p3, %p4085_p2 }
  0x85   : > { %4093 = shalt.err (!%p4090_p4)
}
  0x86   : > { %s4094_s23 = scalar_lea.vmem %s4811_s1, 16  ;;  %s4101_s7 = scalar_lea.vmem %s4811_s1, 32 }
  0x87   : > { %p4095_p5 = scmp.ne.s32.totalorder %s4811_s1, %s4094_s23  ;;  %p4102_p10 = scmp.lt.s32.totalorder %s4811_s1, %s4811_s1 }
  0x88   : > { %p4103_p7 = scmp.lt.s32.totalorder %s4101_s7, %s4094_s23 }
  0x89   : > { %p4097_p6 = pnand %p4095_p5, %p4817_p0 }
  0x8a   : > { %p4104_p8 = por %p4103_p7, %p4102_p10 }
  0x8b   : > { %p4098_p9 = pneg %p4097_p6 }
  0x8d   : > { %p4105_p11 = pnand %p4104_p8, %p4098_p9 }
  0x8f   : > { %4108 = shalt.err (!%p4105_p11)
}
  0x90   : > { %3867 = dma.hbm_to_vmem [thread:$0]  (!%p4805_p12), %s4676_s20, 16, %s4811_s1, [#allocation12]  }
  0x91   : > { %s4573_s26 = smov [#allocation14]   ;;  %s4574_s22 = smov [#allocation17]  }
  0x92   : > { %s844_s18 = sshll.u32 %s4573_s26, 4  ;;  %s868_s8 = sshll.u32 %s4574_s22, 4  ;;  %s845_s18 = int_to_ptr.vmem [resolvable:$true] %s844_s18  ;;  %s869_s8 = int_to_ptr.vmem [resolvable:$true] %s868_s8 }
  0x93   : > { %s4109_s21 = scalar_lea.hbm %s5318_s4, 16 }
  0x94   : > { %p4110_p13 = scmp.ne.s32.totalorder %s5318_s4, %s4109_s21  ;;  %p4116_p3 = scmp.lt.u32.totalorder %s4109_s21, %s5318_s4 }
  0x96   : > { %p4112_p1 = pnand %p4110_p13, %p4817_p0 }
  0x98   : > { %p4113_p2 = pneg %p4112_p1 }
  0x9a   : > { %p4118_p4 = pnand %p4116_p3, %p4113_p2 }
  0x9c   : > { %4121 = shalt.err (!%p4118_p4)
}
  0x9d   : > { %s4122_s23 = scalar_lea.vmem %s845_s18, 16  ;;  %s4129_s1 = scalar_lea.vmem %s845_s18, 32 }
  0x9e   : > { %p4123_p5 = scmp.ne.s32.totalorder %s845_s18, %s4122_s23  ;;  %p4130_p10 = scmp.lt.s32.totalorder %s845_s18, %s845_s18 }
  0x9f   : > { %p4131_p7 = scmp.lt.s32.totalorder %s4129_s1, %s4122_s23 }
  0xa0   : > { %p4125_p6 = pnand %p4123_p5, %p4817_p0 }
  0xa1   : > { %p4132_p8 = por %p4131_p7, %p4130_p10 }
  0xa2   : > { %p4126_p9 = pneg %p4125_p6 }
  0xa4   : > { %p4133_p11 = pnand %p4132_p8, %p4126_p9 }
  0xa6   : > { %4136 = shalt.err (!%p4133_p11)
}
  0xa7   : > { %3873 = dma.hbm_to_vmem [thread:$0]  (!%p4805_p12), %s5318_s4, 16, %s845_s18, [#allocation15]  }
  0xa8   : > { %s4137_s21 = scalar_lea.hbm %s4701_s19, 768 }
  0xa9   : > { %p4138_p13 = scmp.ne.s32.totalorder %s4701_s19, %s4137_s21  ;;  %p4144_p3 = scmp.lt.u32.totalorder %s4137_s21, %s4701_s19 }
  0xab   : > { %p4140_p1 = pnand %p4138_p13, %p4817_p0 }
  0xad   : > { %p4141_p2 = pneg %p4140_p1 }
  0xaf   : > { %p4146_p4 = pnand %p4144_p3, %p4141_p2 }
  0xb1   : > { %4149 = shalt.err (!%p4146_p4)
}
  0xb2   : > { %s4150_s7 = scalar_lea.vmem %s869_s8, 768  ;;  %p4158_p10 = scmp.lt.s32.totalorder %s869_s8, %s869_s8 }
  0xb3   : > { %p4151_p5 = scmp.ne.s32.totalorder %s869_s8, %s4150_s7  ;;  %p4159_p7 = scmp.lt.s32.totalorder %s4150_s7, %s4150_s7 }
  0xb5   : > { %p4153_p6 = pnand %p4151_p5, %p4817_p0  ;;  %p4160_p8 = por %p4159_p7, %p4158_p10 }
  0xb7   : > { %p4154_p9 = pneg %p4153_p6 }
  0xb9   : > { %p4161_p11 = pnand %p4160_p8, %p4154_p9 }
  0xbb   : > { %4164 = shalt.err (!%p4161_p11)
}
  0xbc   : > { %s5294_s26 = smov 128   ;;  %s4576_s18 = smov 8  }
  0xbd   : > { %3879 = dma.hbm_to_vmem [thread:$0]  (!%p4805_p12), %s4701_s19, 768, %s869_s8, [#allocation18], %s5294_s26, %s5294_s26, %s4576_s18  }
  0xbe   : > { %s4577_s22 = smov [#allocation20]   ;;  %s4578_s1 = smov [#allocation23]  }
  0xbf   : > { %s895_s23 = sshll.u32 %s4577_s22, 4  ;;  %s919_s21 = sshll.u32 %s4578_s1, 4  ;;  %s896_s23 = int_to_ptr.vmem [resolvable:$true] %s895_s23  ;;  %s920_s21 = int_to_ptr.vmem [resolvable:$true] %s919_s21 }
  0xc0   : > { %s4165_s7 = scalar_lea.hbm %s4711_s29, 16 }
  0xc1   : > { %p4166_p13 = scmp.ne.s32.totalorder %s4711_s29, %s4165_s7  ;;  %p4172_p3 = scmp.lt.u32.totalorder %s4165_s7, %s4711_s29 }
  0xc3   : > { %p4168_p1 = pnand %p4166_p13, %p4817_p0 }
  0xc5   : > { %p4169_p2 = pneg %p4168_p1 }
  0xc7   : > { %p4174_p4 = pnand %p4172_p3, %p4169_p2 }
  0xc9   : > { %4177 = shalt.err (!%p4174_p4)
}
  0xca   : > { %s4178_s4 = scalar_lea.vmem %s896_s23, 16  ;;  %s4185_s8 = scalar_lea.vmem %s896_s23, 32 }
  0xcb   : > { %p4179_p5 = scmp.ne.s32.totalorder %s896_s23, %s4178_s4  ;;  %p4186_p10 = scmp.lt.s32.totalorder %s896_s23, %s896_s23 }
  0xcc   : > { %p4187_p7 = scmp.lt.s32.totalorder %s4185_s8, %s4178_s4 }
  0xcd   : > { %p4181_p6 = pnand %p4179_p5, %p4817_p0 }
  0xce   : > { %p4188_p8 = por %p4187_p7, %p4186_p10 }
  0xcf   : > { %p4182_p9 = pneg %p4181_p6 }
  0xd1   : > { %p4189_p11 = pnand %p4188_p8, %p4182_p9 }
  0xd3   : > { %4192 = shalt.err (!%p4189_p11)
}
  0xd4   : > { %3885 = dma.hbm_to_vmem [thread:$0]  (!%p4805_p12), %s4711_s29, 16, %s896_s23, [#allocation21]  }
  0xd5   : > { %s4193_s22 = scalar_lea.hbm %s4721_s24, 16 }
  0xd6   : > { %p4194_p13 = scmp.ne.s32.totalorder %s4721_s24, %s4193_s22  ;;  %p4200_p3 = scmp.lt.u32.totalorder %s4193_s22, %s4721_s24 }
  0xd8   : > { %p4196_p1 = pnand %p4194_p13, %p4817_p0 }
  0xda   : > { %p4197_p2 = pneg %p4196_p1 }
  0xdc   : > { %p4202_p4 = pnand %p4200_p3, %p4197_p2 }
  0xde   : > { %4205 = shalt.err (!%p4202_p4)
}
  0xdf   : > { %s4206_s4 = scalar_lea.vmem %s920_s21, 16  ;;  %s4213_s1 = scalar_lea.vmem %s920_s21, 32 }
  0xe0   : > { %p4207_p5 = scmp.ne.s32.totalorder %s920_s21, %s4206_s4  ;;  %p4214_p10 = scmp.lt.s32.totalorder %s920_s21, %s920_s21 }
  0xe1   : > { %p4215_p7 = scmp.lt.s32.totalorder %s4213_s1, %s4206_s4 }
  0xe2   : > { %p4209_p6 = pnand %p4207_p5, %p4817_p0 }
  0xe3   : > { %p4216_p8 = por %p4215_p7, %p4214_p10 }
  0xe4   : > { %p4210_p9 = pneg %p4209_p6 }
  0xe6   : > { %p4217_p11 = pnand %p4216_p8, %p4210_p9 }
  0xe8   : > { %4220 = shalt.err (!%p4217_p11)
}
  0xe9   : > { %3891 = dma.hbm_to_vmem [thread:$0]  (!%p4805_p12), %s4721_s24, 16, %s920_s21, [#allocation24]  }
  0xea   : > { %s4579_s23 = smov [#allocation2]   ;;  %s4580_s8 = smov [#allocation7]  }
  0xeb   : > { %s746_s7 = sshll.u32 %s4579_s23, 4  ;;  %s774_s22 = sshll.u32 %s4580_s8, 4  ;;  %s747_s7 = int_to_ptr.vmem [resolvable:$true] %s746_s7  ;;  %s775_s22 = int_to_ptr.vmem [resolvable:$true] %s774_s22 }
  0xec   : > { %s4221_s26 = scalar_lea.hbm %s4616_s17, 64 }
  0xed   : > { %p4222_p13 = scmp.ne.s32.totalorder %s4616_s17, %s4221_s26  ;;  %p4228_p3 = scmp.lt.u32.totalorder %s4221_s26, %s4616_s17 }
  0xef   : > { %p4224_p1 = pnand %p4222_p13, %p4817_p0 }
  0xf1   : > { %p4225_p2 = pneg %p4224_p1 }
  0xf3   : > { %p4230_p4 = pnand %p4228_p3, %p4225_p2 }
  0xf5   : > { %4233 = shalt.err (!%p4230_p4)
}
  0xf6   : > { %s4234_s4 = scalar_lea.vmem %s747_s7, 64  ;;  %p4242_p10 = scmp.lt.s32.totalorder %s747_s7, %s747_s7 }
  0xf7   : > { %p4235_p5 = scmp.ne.s32.totalorder %s747_s7, %s4234_s4  ;;  %p4243_p7 = scmp.lt.s32.totalorder %s4234_s4, %s4234_s4 }
  0xf9   : > { %p4237_p6 = pnand %p4235_p5, %p4817_p0  ;;  %p4244_p8 = por %p4243_p7, %p4242_p10 }
  0xfb   : > { %p4238_p9 = pneg %p4237_p6 }
  0xfd   : > { %p4245_p11 = pnand %p4244_p8, %p4238_p9 }
  0xff   : > { %4248 = shalt.err (!%p4245_p11)
}
 0x100   : > { %3852 = dma.hbm_to_vmem [thread:$0]  (!%p4805_p12), %s4616_s17, 64, %s747_s7, [#allocation3]  }
 0x101   : > { %s4249_s26 = scalar_lea.hbm %s5317_s3, 64 }
 0x102   : > { %p4250_p13 = scmp.ne.s32.totalorder %s5317_s3, %s4249_s26  ;;  %p4256_p3 = scmp.lt.u32.totalorder %s4249_s26, %s5317_s3 }
 0x104   : > { %p4252_p1 = pnand %p4250_p13, %p4817_p0 }
 0x106   : > { %p4253_p2 = pneg %p4252_p1 }
 0x108   : > { %p4258_p4 = pnand %p4256_p3, %p4253_p2 }
 0x10a   : > { %4261 = shalt.err (!%p4258_p4)
}
 0x10b   : > { %s4262_s21 = scalar_lea.vmem %s775_s22, 64  ;;  %p4270_p10 = scmp.lt.s32.totalorder %s775_s22, %s775_s22 }
 0x10c   : > { %p4263_p5 = scmp.ne.s32.totalorder %s775_s22, %s4262_s21  ;;  %p4271_p7 = scmp.lt.s32.totalorder %s4262_s21, %s4262_s21 }
 0x10e   : > { %p4265_p6 = pnand %p4263_p5, %p4817_p0  ;;  %p4272_p8 = por %p4271_p7, %p4270_p10 }
 0x110   : > { %p4266_p9 = pneg %p4265_p6 }
 0x112   : > { %p4273_p11 = pnand %p4272_p8, %p4266_p9 }
 0x114   : > { %4276 = shalt.err (!%p4273_p11)
}
 0x115   : > { %3858 = dma.hbm_to_vmem [thread:$0]  (!%p4805_p12), %s5317_s3, 64, %s775_s22, [#allocation6]  }
 0x116   : > { %s4581_s1 = smov [#allocation10]   ;;  %s4582_s7 = smov [#allocation13]  }
 0x117   : > { %s796_s23 = sshll.u32 %s4581_s1, 4  ;;  %s833_s8 = sshll.u32 %s4582_s7, 4  ;;  %s797_s23 = int_to_ptr.vmem [resolvable:$true] %s796_s23  ;;  %s834_s8 = int_to_ptr.vmem [resolvable:$true] %s833_s8 }
 0x118   : > { %s4277_s4 = scalar_lea.hbm %s4646_s14, 64 }
 0x119   : > { %p4278_p13 = scmp.ne.s32.totalorder %s4646_s14, %s4277_s4  ;;  %p4284_p3 = scmp.lt.u32.totalorder %s4277_s4, %s4646_s14 }
 0x11b   : > { %p4280_p1 = pnand %p4278_p13, %p4817_p0 }
 0x11d   : > { %p4281_p2 = pneg %p4280_p1 }
 0x11f   : > { %p4286_p4 = pnand %p4284_p3, %p4281_p2 }
 0x121   : > { %4289 = shalt.err (!%p4286_p4)
}
 0x122   : > { %s4290_s26 = scalar_lea.vmem %s797_s23, 64  ;;  %p4298_p10 = scmp.lt.s32.totalorder %s797_s23, %s797_s23 }
 0x123   : > { %p4291_p5 = scmp.ne.s32.totalorder %s797_s23, %s4290_s26  ;;  %p4299_p7 = scmp.lt.s32.totalorder %s4290_s26, %s4290_s26 }
 0x125   : > { %p4293_p6 = pnand %p4291_p5, %p4817_p0  ;;  %p4300_p8 = por %p4299_p7, %p4298_p10 }
 0x127   : > { %p4294_p9 = pneg %p4293_p6 }
 0x129   : > { %p4301_p11 = pnand %p4300_p8, %p4294_p9 }
 0x12b   : > { %4304 = shalt.err (!%p4301_p11)
}
 0x12c   : > { %3864 = dma.hbm_to_vmem [thread:$0]  (!%p4805_p12), %s4646_s14, 64, %s797_s23, [#allocation9]  }
 0x12d   : > { %s4305_s22 = scalar_lea.hbm %s4681_s27, 16 }
 0x12e   : > { %p4306_p13 = scmp.ne.s32.totalorder %s4681_s27, %s4305_s22  ;;  %p4312_p3 = scmp.lt.u32.totalorder %s4305_s22, %s4681_s27 }
 0x130   : > { %p4308_p1 = pnand %p4306_p13, %p4817_p0 }
 0x132   : > { %p4309_p2 = pneg %p4308_p1 }
 0x134   : > { %p4314_p4 = pnand %p4312_p3, %p4309_p2 }
 0x136   : > { %4317 = shalt.err (!%p4314_p4)
}
 0x137   : > { %s4318_s21 = scalar_lea.vmem %s834_s8, 16  ;;  %s4325_s1 = scalar_lea.vmem %s834_s8, 32 }
 0x138   : > { %p4319_p5 = scmp.ne.s32.totalorder %s834_s8, %s4318_s21  ;;  %p4326_p10 = scmp.lt.s32.totalorder %s834_s8, %s834_s8 }
 0x139   : > { %p4327_p7 = scmp.lt.s32.totalorder %s4325_s1, %s4318_s21 }
 0x13a   : > { %p4321_p6 = pnand %p4319_p5, %p4817_p0 }
 0x13b   : > { %p4328_p8 = por %p4327_p7, %p4326_p10 }
 0x13c   : > { %p4322_p9 = pneg %p4321_p6 }
 0x13e   : > { %p4329_p11 = pnand %p4328_p8, %p4322_p9 }
 0x140   : > { %4332 = shalt.err (!%p4329_p11)
}
 0x141   : > { %3870 = dma.hbm_to_vmem [thread:$0]  (!%p4805_p12), %s4681_s27, 16, %s834_s8, [#allocation12]  }
 0x142   : > { %s4583_s23 = smov [#allocation16]   ;;  %s4584_s4 = smov [#allocation19]  }
 0x143   : > { %s855_s7 = sshll.u32 %s4583_s23, 4  ;;  %s881_s26 = sshll.u32 %s4584_s4, 4  ;;  %s856_s7 = int_to_ptr.vmem [resolvable:$true] %s855_s7  ;;  %s882_s26 = int_to_ptr.vmem [resolvable:$true] %s881_s26 }
 0x144   : > { %s4333_s22 = scalar_lea.hbm %s4691_s6, 16 }
 0x145   : > { %p4334_p13 = scmp.ne.s32.totalorder %s4691_s6, %s4333_s22  ;;  %p4340_p3 = scmp.lt.u32.totalorder %s4333_s22, %s4691_s6 }
 0x147   : > { %p4336_p1 = pnand %p4334_p13, %p4817_p0 }
 0x149   : > { %p4337_p2 = pneg %p4336_p1 }
 0x14b   : > { %p4342_p4 = pnand %p4340_p3, %p4337_p2 }
 0x14d   : > { %4345 = shalt.err (!%p4342_p4)
}
 0x14e   : > { %s4346_s21 = scalar_lea.vmem %s856_s7, 16  ;;  %s4353_s8 = scalar_lea.vmem %s856_s7, 32 }
 0x14f   : > { %p4347_p5 = scmp.ne.s32.totalorder %s856_s7, %s4346_s21  ;;  %p4354_p10 = scmp.lt.s32.totalorder %s856_s7, %s856_s7 }
 0x150   : > { %p4355_p7 = scmp.lt.s32.totalorder %s4353_s8, %s4346_s21 }
 0x151   : > { %p4349_p6 = pnand %p4347_p5, %p4817_p0 }
 0x152   : > { %p4356_p8 = por %p4355_p7, %p4354_p10 }
 0x153   : > { %p4350_p9 = pneg %p4349_p6 }
 0x155   : > { %p4357_p11 = pnand %p4356_p8, %p4350_p9 }
 0x157   : > { %4360 = shalt.err (!%p4357_p11)
}
 0x158   : > { %3876 = dma.hbm_to_vmem [thread:$0]  (!%p4805_p12), %s4691_s6, 16, %s856_s7, [#allocation15]  }
 0x159   : > { %s4361_s1 = scalar_lea.hbm %s4706_s12, 768 }
 0x15a   : > { %p4362_p13 = scmp.ne.s32.totalorder %s4706_s12, %s4361_s1  ;;  %p4368_p3 = scmp.lt.u32.totalorder %s4361_s1, %s4706_s12 }
 0x15c   : > { %p4364_p1 = pnand %p4362_p13, %p4817_p0 }
 0x15e   : > { %p4365_p2 = pneg %p4364_p1 }
 0x160   : > { %p4370_p4 = pnand %p4368_p3, %p4365_p2 }
 0x162   : > { %4373 = shalt.err (!%p4370_p4)
}
 0x163   : > { %s4374_s23 = scalar_lea.vmem %s882_s26, 768  ;;  %p4382_p10 = scmp.lt.s32.totalorder %s882_s26, %s882_s26 }
 0x164   : > { %p4375_p5 = scmp.ne.s32.totalorder %s882_s26, %s4374_s23  ;;  %p4383_p7 = scmp.lt.s32.totalorder %s4374_s23, %s4374_s23 }
 0x166   : > { %p4377_p6 = pnand %p4375_p5, %p4817_p0  ;;  %p4384_p8 = por %p4383_p7, %p4382_p10 }
 0x168   : > { %p4378_p9 = pneg %p4377_p6 }
 0x16a   : > { %p4385_p11 = pnand %p4384_p8, %p4378_p9 }
 0x16c   : > { %4388 = shalt.err (!%p4385_p11)
}
 0x16d   : > { %s5331_s7 = smov 128   ;;  %s4585_s4 = smov [#allocation22]  }
 0x16e   : > { %3882 = dma.hbm_to_vmem [thread:$0]  (!%p4805_p12), %s4706_s12, 768, %s882_s26, [#allocation18], %s5331_s7, %s5331_s7, %s4576_s18  }
 0x16f   : > { %s905_s22 = sshll.u32 %s4585_s4, 4  ;;  %s4586_s21 = smov [#allocation25]   ;;  %s906_s22 = int_to_ptr.vmem [resolvable:$true] %s905_s22 }
 0x170   : > { %s935_s8 = sshll.u32 %s4586_s21, 4  ;;  %s4389_s1 = scalar_lea.hbm %s4716_s30, 768  ;;  %s936_s8 = int_to_ptr.vmem [resolvable:$true] %s935_s8 }
 0x171   : > { %p4390_p13 = scmp.ne.s32.totalorder %s4716_s30, %s4389_s1  ;;  %p4396_p3 = scmp.lt.u32.totalorder %s4389_s1, %s4716_s30 }
 0x173   : > { %p4392_p1 = pnand %p4390_p13, %p4817_p0 }
 0x175   : > { %p4393_p2 = pneg %p4392_p1 }
 0x177   : > { %p4398_p4 = pnand %p4396_p3, %p4393_p2 }
 0x179   : > { %4401 = shalt.err (!%p4398_p4)
}
 0x17a   : > { %s4402_s23 = scalar_lea.vmem %s906_s22, 768  ;;  %p4410_p10 = scmp.lt.s32.totalorder %s906_s22, %s906_s22 }
 0x17b   : > { %p4403_p5 = scmp.ne.s32.totalorder %s906_s22, %s4402_s23  ;;  %p4411_p7 = scmp.lt.s32.totalorder %s4402_s23, %s4402_s23 }
 0x17d   : > { %p4405_p6 = pnand %p4403_p5, %p4817_p0  ;;  %p4412_p8 = por %p4411_p7, %p4410_p10 }
 0x17f   : > { %p4406_p9 = pneg %p4405_p6 }
 0x181   : > { %p4413_p11 = pnand %p4412_p8, %p4406_p9 }
 0x183   : > { %4416 = shalt.err (!%p4413_p11)
}
 0x184   : > { %3888 = dma.hbm_to_vmem [thread:$0]  (!%p4805_p12), %s4716_s30, 768, %s906_s22, [#allocation21], %s5331_s7, %s5331_s7, %s4576_s18  }
 0x185   : > { %s4417_s26 = scalar_lea.hbm %s4736_s13, 768 }
 0x186   : > { %p4418_p13 = scmp.ne.s32.totalorder %s4736_s13, %s4417_s26  ;;  %p4424_p3 = scmp.lt.u32.totalorder %s4417_s26, %s4736_s13 }
 0x188   : > { %p4420_p1 = pnand %p4418_p13, %p4817_p0 }
 0x18a   : > { %p4421_p2 = pneg %p4420_p1 }
 0x18c   : > { %p4426_p4 = pnand %p4424_p3, %p4421_p2 }
 0x18e   : > { %4429 = shalt.err (!%p4426_p4)
}
 0x18f   : > { %s4430_s4 = scalar_lea.vmem %s936_s8, 768  ;;  %p4438_p10 = scmp.lt.s32.totalorder %s936_s8, %s936_s8 }
 0x190   : > { %p4431_p5 = scmp.ne.s32.totalorder %s936_s8, %s4430_s4  ;;  %p4439_p7 = scmp.lt.s32.totalorder %s4430_s4, %s4430_s4 }
 0x192   : > { %p4433_p6 = pnand %p4431_p5, %p4817_p0  ;;  %p4440_p8 = por %p4439_p7, %p4438_p10 }
 0x194   : > { %p4434_p9 = pneg %p4433_p6 }
 0x196   : > { %p4441_p11 = pnand %p4440_p8, %p4434_p9 }
 0x198   : > { %4444 = shalt.err (!%p4441_p11)
}
 0x199   : > { %3894 = dma.hbm_to_vmem [thread:$0]  (!%p4805_p12), %s4736_s13, 768, %s936_s8, [#allocation24], %s5331_s7, %s5331_s7, %s4576_s18  }
 0x19a   : > { %p5332_p13 = scmp.ne.s32.totalorder %s5328_s2, 0 }
 0x19b   : > { %p5333_p1 = scmp.eq.s32.totalorder (!%p5332_p13), %s4769_s0, 0 }
 0x19c   : > { %970 = sbr.rel (%p5332_p13) target bundleno = 2931 (0xb73), region = 136 }
 0x1a3   : > { %4490 = dma.done.wait (%p5333_p1), [#allocation3], 64   ;;  %p5334_p0 = pmov %p5333_p1 }
 0x1a5   : > { %4492 = vsyncadd (%p5334_p0), [#allocation3], 4294967232  ;;  %p5335_p2 = pmov %p5334_p0 }
 0x1a6   : > { %p5336_p3 = pmov %p5334_p0 }
 0x1a7   : > { %4494 = dma.done.wait (%p5335_p2), [#allocation6], 128  }
 0x1a8   : > { %4496 = vsyncadd (%p5336_p3), [#allocation6], 4294967168  ;;  %p5337_p4 = pmov %p5334_p0 }
 0x1a9   : > { %p5338_p12 = pmov %p5334_p0 }
 0x1aa   : > { %4498 = dma.done.wait (%p5337_p4), [#allocation9], 128  }
 0x1ab   : > { %4500 = vsyncadd (%p5338_p12), [#allocation9], 4294967168  ;;  %p5339_p5 = pmov %p5334_p0 }
 0x1ac   : > { %p5340_p6 = pmov %p5334_p0 }
 0x1ad   : > { %4502 = dma.done.wait (%p5339_p5), [#allocation12], 32  }
 0x1ae   : > { %4504 = vsyncadd (%p5340_p6), [#allocation12], 4294967264  ;;  %p5341_p9 = pmov %p5334_p0 }
 0x1af   : > { %p5342_p10 = pmov %p5334_p0 }
 0x1b0   : > { %4506 = dma.done.wait (%p5341_p9), [#allocation15], 32  }
 0x1b1   : > { %4508 = vsyncadd (%p5342_p10), [#allocation15], 4294967264  ;;  %p5343_p7 = pmov %p5334_p0 }
 0x1b2   : > { %p5344_p8 = pmov %p5334_p0 }
 0x1b3   : > { %4510 = dma.done.wait (%p5343_p7), [#allocation18], 1536  }
 0x1b4   : > { %4512 = vsyncadd (%p5344_p8), [#allocation18], 4294965760  ;;  %p5345_p11 = pmov %p5334_p0 }
 0x1b5   : > { %p5346_p13 = pmov %p5334_p0 }
 0x1b6   : > { %4514 = dma.done.wait (%p5345_p11), [#allocation21], 784  }
 0x1b7   : > { %4516 = vsyncadd (%p5346_p13), [#allocation21], 4294966512  ;;  %p5347_p1 = pmov %p5334_p0 }
 0x1b9   : > { %4518 = dma.done.wait (%p5347_p1), [#allocation24], 784  }
 0x1ba   : > { %4520 = vsyncadd (%p5334_p0), [#allocation24], 4294966512  ;;  %s5348_s11 = sld [smem:[#allocation36_spill]]  ;;  %s5349_s2 = sld [smem:[#allocation38_spill]]  ;;  %v4587_v0 = vmov 0   ;;  %vm1127_vm0 = vcmask 416768   ;;  %v1319_v51 = vlaneseq }
 0x1bb   : > { %s5350_s16 = sld [smem:[#allocation37_spill]]  ;;  %p1106_p2 = scmp.lt.s32.totalorder %s4769_s0, 1  ;;  %4013 = vset.pattern.permute.xlu0 %v4587_v0  ;;  %vm1224_vm1 = vcmask 7168   ;;  %vm1226_vm2 = vcmask 0   ;;  %vm1134_vm3 = vcmask 1042432   ;;  %v4588_v25 = vmov 0.0  }
 0x1bc   : > { %s5351_s8 = sld [smem:[#allocation40_spill]]  ;;  %v1242_v26 = vld [vmem:[#allocation2] sm:$0x7]  ;;  %vm4589_vm4 = vmmov 0   ;;  %vm1215_vm5 = vcmask 16384   ;;  %vm1213_vm6 = vcmask 23552  }
 0x1bd   : > { %s1107_s18 = scalar_select %p1106_p2, %s4769_s0, 1  ;;  %v1320_v52 = vshrl.u32 %v1319_v51, 7  ;;  %v4590_v59 = vmov 0.0|0.0   ;;  %vm1441_vm7 = vcmask 1040384   ;;  %vm4591_vm8 = vmmov 1  }
 0x1be   : > { %s5352_s1 = sld [smem:[#allocation45_spill]]  ;;  %s5353_s23 = sld [smem:[#allocation41_spill]]  ;;  %vm5085_vm9 = vmpackc.low %vm1441_vm7, %vm4591_vm8  ;;  %vm1437_vm10 = vcmask 72704   ;;  %vm1684_vm11 = vcmask 392192   ;;  %vm2952_vm14 = vcmask 409600  }
 0x1bf   : > { %s3290_s7 = sshll.u32 %s1107_s18, 4  ;;  %v1321_v53 = vsub.s32 0, %v1320_v52  ;;  %s5356_s26 = sld [smem:[#allocation48_spill]] }
 0x1c0   : > { %s5029_s22 = scalar_lea.vmem %s5348_s11, %s3290_s7  ;;  %v1120_v1 = vld [vmem:[%s5349_s2] sm:$0xff]  ;;  %v1121_v2 = vld [vmem:[%s5349_s2 + $0x8] sm:$0xff]  ;;  %v1122_v3 = vld [vmem:[%s5349_s2 + $0x10] sm:$0xff]  ;;  %s5357_s4 = sld [smem:[#allocation44_spill]] }
 0x1c1   : > { %s1115_s21 = scalar_lea.vmem %s5350_s16, %s3290_s7  ;;  %v3646_v4 = vpack.c.bf16 %v1121_v2, %v1120_v1  ;;  %v1123_v5 = vld [vmem:[%s5349_s2 + $0x18] sm:$0xff]  ;;  %v1124_v7 = vld [vmem:[%s5349_s2 + $0x20] sm:$0xff]  ;;  %v1125_v8 = vld [vmem:[%s5349_s2 + $0x28] sm:$0xff]  ;;  %s5358_s11 = sld [smem:[#allocation46_spill]] }
 0x1c2   : > { %v3650_v6 = vpack.c.bf16 %v1123_v5, %v1122_v3  ;;  %v5039_v9 = vld [vmem:[%s5029_s22] sm:$0xff]  ;;  %v1119_v11 = vld [vmem:[%s1115_s21 + $0x8] sm:$0x1]  ;;  %v3654_v14 = vpack.c.bf16 %v1125_v8, %v1124_v7  ;;  %v1126_v18 = vld [vmem:[%s5349_s2 + $0x30] sm:$0x7]  ;;  %s5360_s18 = sld [smem:[#allocation47_spill]] }
 0x1c3   : > { %3647 = vmatprep.subr.bf16.mxu0 %v3646_v4  ;;  %v1118_v10 = vld [vmem:[%s1115_s21] sm:$0xff]  ;;  %3418 = vmatprep.mubr.msk.f32.mxu0 %vm1127_vm0, %v5039_v9  ;;  %v1227_v13 = vsel %vm1226_vm2, %v1119_v11, 0.0  ;;  %v1117_v21 = vld [vmem:[%s5029_s22 + $0x8] sm:$0x1]  ;;  %v1327_v29 = vld [vmem:[%s5351_s8 + $0x10] sm:$0xff]  ;;  %s5361_s7 = sld [smem:[#allocation50_spill]] }
 0x1c4   : > { %3649 = vmatpush3.bf16.msra.mxu0 %v3646_v4  ;;  %v1225_v12 = vsel %vm1224_vm1, %v1118_v10, 0.0  ;;  %v4014_v24 = vpack.i.bf16 %v1119_v11, %v1118_v10  ;;  %v1325_v27 = vld [vmem:[%s5351_s8] sm:$0xff]  ;;  %v1326_v28 = vld [vmem:[%s5351_s8 + $0x8] sm:$0xff]  ;;  %v1328_v31 = vld [vmem:[%s5351_s8 + $0x18] sm:$0xff]  ;;  %s5363_s21 = sld [smem:[#allocation51_spill]]  ;;  %s5364_s5 = sld [smem:[#allocation52_spill]] }
 0x1c5   : > { %3651 = vmatprep.subr.bf16.mxu0 %v3650_v6  ;;  %v1228_v15 = vadd.f32 %v1227_v13, %v1225_v12  ;;  %v3658_v30 = vpack.c.bf16 %v1326_v28, %v1325_v27  ;;  %v3662_v32 = vpack.c.bf16 %v1328_v31, %v1327_v29  ;;  %v1329_v47 = vld [vmem:[%s5351_s8 + $0x20] sm:$0xff]  ;;  %v1330_v48 = vld [vmem:[%s5351_s8 + $0x28] sm:$0xff]  ;;  %v1331_v50 = vld [vmem:[%s5351_s8 + $0x30] sm:$0x7]  ;;  %p5365_p4 = scmp.ne.s32.totalorder %s5325_s28, 0 }
 0x1c6   : > { %v3666_v49 = vpack.c.bf16 %v1330_v48, %v1329_v47  ;;  %v1678_v60 = vld [vmem:[%s5352_s1] sm:$0xff]  ;;  %v1679_v61 = vld [vmem:[%s5352_s1 + $0x8] sm:$0xff]  ;;  %v1680_v62 = vld [vmem:[%s5352_s1 + $0x10] sm:$0xff] }
 0x1c7   : > { %v1229_v16 = vrot.slane %v1228_v15, 4  ;;  %3659 = vmatprep.subr.bf16.mxu1 %v3658_v30  ;;  %v3683_v63 = vpack.c.bf16 %v1679_v61, %v1678_v60  ;;  %v1681_v0 = vld [vmem:[%s5352_s1 + $0x18] sm:$0xff]  ;;  %v1682_v2 = vld [vmem:[%s5352_s1 + $0x20] sm:$0xff]  ;;  %v1683_v3 = vld [vmem:[%s5352_s1 + $0x28] sm:$0xff]  ;;  %s5359_s16 = smov %s5358_s11 }
 0x1c8   : > { %3653 = vmatpush3.bf16.msra.mxu0 %v3650_v6  ;;  %3661 = vmatpush3.bf16.msra.mxu1 %v3658_v30  ;;  %v3686_v1 = vpack.c.bf16 %v1681_v0, %v1680_v62  ;;  %v3689_v4 = vpack.c.bf16 %v1683_v3, %v1682_v2  ;;  %v3251_v5 = vld [vmem:[%s5353_s23] ss:$0 sm:$0xff]  ;;  %v1434_v13 = vld [vmem:[#allocation7] sm:$0x7]  ;;  %v1673_v28 = vld [vmem:[%s5357_s4 + $0x8] sm:$0xff]  ;;  %s1104_s23 = sand.u32 1, %s4531_s10  }
 0x1c9   : > { %3655 = vmatprep.subr.bf16.mxu0 %v3654_v14  ;;  %v1230_v17 = vadd.f32 %v1229_v16, %v1228_v15  ;;  %3663 = vmatprep.subr.bf16.mxu1 %v3662_v32  ;;  %v1672_v27 = vld [vmem:[%s5357_s4] sm:$0xff]  ;;  %v1674_v30 = vld [vmem:[%s5357_s4 + $0x10] sm:$0xff]  ;;  %v1675_v31 = vld [vmem:[%s5357_s4 + $0x18] sm:$0xff]  ;;  %s5362_s22 = smov %s5361_s7  ;;  %s2955_s2 = scalar_lea.sflag [#allocation4], %s1104_s23 }
 0x1ca   : > { %v3692_v29 = vpack.c.bf16 %v1673_v28, %v1672_v27  ;;  %v1907_v47 = vld [vmem:[%s5359_s16 + $0x18] sm:$0xff]  ;;  %v1908_v51 = vld [vmem:[%s5359_s16 + $0x20] sm:$0xff]  ;;  %v1909_v52 = vld [vmem:[%s5359_s16 + $0x28] sm:$0xff] }
 0x1cb   : > { %v1231_v19 = vrot.slane %v1230_v17, 2  ;;  %v3267_v3 = vld [vmem:[%s5360_s18] ss:$0 sm:$0xff]  ;;  %v2330_v27 = vld [vmem:[#allocation17 + $0x28] sm:$0xff]  ;;  %s1105_s18 = scalar_lea.vmem [#allocation26], %s1104_s23 }
 0x1cc   : > { %3657 = vmatpush3.bf16.msra.mxu0 %v3654_v14  ;;  %3665 = vmatpush3.bf16.msra.mxu1 %v3662_v32  ;;  %v1435_v14 = vld [vmem:[#allocation8] sm:$0x7] }
 0x1cd   : > { %3416 = vmatprep.subr.msk.mxu0 %vm1134_vm3, %v1126_v18  ;;  %v1232_v20 = vadd.f32 %v1231_v19, %v1230_v17  ;;  %3667 = vmatprep.subr.bf16.mxu1 %v3666_v49  ;;  %v1515_v19 = vadd.f32 %v1435_v14, %v1434_v13 }
 0x1cf   : > { %v1233_v22 = vrot.slane %v1232_v20, 1 }
 0x1d0   : > { %3417 = vmatpush3.msk.msra.mxu0 %vm1134_vm3, %v1126_v18  ;;  %3669 = vmatpush3.bf16.msra.mxu1 %v3666_v49 }
 0x1d1   : > { %3419 = vmatmul.mubr.msk.f32.vlgmr.msra.gmra.mrb[0].mxu0 %vm1127_vm0, %v1117_v21  ;;  %v1234_v23 = vadd.f32 %v1233_v22, %v1232_v20  ;;  %3421 = vmatprep.subr.mxu0 %v4588_v25  ;;  %v1436_v20 = vld [vmem:[#allocation10] sm:$0x7] }
 0x1d2   : > { %3422 = vmatpush3.msk.msra.mxu0 %vm1134_vm3, %v1242_v26  ;;  %3423 = vmatprep.mubr.msk.f32.mxu0 %vm4589_vm4, %v4588_v25  ;;  %v1516_v22 = vadd.f32 %v1515_v19, %v1436_v20  ;;  %v2325_v19 = vld [vmem:[#allocation17] sm:$0xff] }
 0x1d3   : > { %1237 = vperm.xlu0 %4013, %v1234_v23   ;;  %3438 = vmatprep.subr.msk.mxu1 %vm1134_vm3, %v1331_v50  ;;  %v1994_v23 = vld [vmem:[%s5356_s26] sm:$0xff] }
 0x1d4   : > { %3439 = vmatpush3.msk.msra.mxu1 %vm1134_vm3, %v1331_v50  ;;  %3670 = vmatprep.subr.bf16.mxu0 %v4590_v59 }
 0x1d5   : > { %3682 = vmatprep.subr.bf16.mxu1 %v4590_v59 }
 0x1d7   : > { %4015 = vperm.xlu0 %4013, %v4014_v24   ;;  %v1995_v24 = vld [vmem:[%s5356_s26 + $0x8] sm:$0xff] }
 0x1d8   : > { %v3714_v26 = vpack.c.bf16 %v1995_v24, %v1994_v23  ;;  %v2328_v23 = vld [vmem:[#allocation17 + $0x18] sm:$0xff] }
 0x252   : > { %v1238_v37 = vpop.permute.xlu0 %1237 }
 0x253   : > { %4019 = vrcp.f32 %v1238_v37 }
 0x256   : > { %v4016_v10 = vpop.permute.xlu0 %4015 }
 0x257   : > { %v4018_v16 = vunpack.i.h.bf16 %v4016_v10  ;;  %v4017_v17 = vunpack.i.l.bf16 %v4016_v10 }
 0x25d   : > { %v4020_v44 = vpop.eup %4019 }
 0x2a4   : > { %v3420_v33 = vpop.f32.mrb[0].mxu0 }
 0x2a5   : > { %v1216_v34 = vsel %vm1215_vm5, %v3420_v33, 0.0  ;;  %v1204_v35 = vpop.f32.mrb[1].mxu0 }
 0x2a6   : > { %v1214_v36 = vsel %vm1213_vm6, %v1204_v35, 0.0  ;;  %v1676_v35 = vld [vmem:[%s5357_s4 + $0x20] sm:$0xff] }
 0x2a7   : > { %v1217_v38 = vadd.f32 %v1216_v34, %v1214_v36  ;;  %v3695_v34 = vpack.c.bf16 %v1675_v31, %v1674_v30  ;;  %v1677_v36 = vld [vmem:[%s5357_s4 + $0x28] sm:$0xff]  ;;  %v2635_v30 = vld [vmem:[#allocation22 + $0x8] sm:$0xff] }
 0x2a9   : > { %v1218_v39 = vrot.slane %v1217_v38, 4 }
 0x2ab   : > { %v1219_v40 = vadd.f32 %v1218_v39, %v1217_v38  ;;  %v3698_v39 = vpack.c.bf16 %v1677_v36, %v1676_v35  ;;  %v2321_v35 = vld [vmem:[%s5362_s22 + $0x10] sm:$0xff]  ;;  %v2322_v36 = vld [vmem:[%s5362_s22 + $0x18] sm:$0xff] }
 0x2ad   : > { %v1220_v41 = vrot.slane %v1219_v40, 2 }
 0x2af   : > { %v1221_v42 = vadd.f32 %v1220_v41, %v1219_v40  ;;  %v1904_v40 = vld [vmem:[%s5358_s11] sm:$0xff]  ;;  %v1905_v41 = vld [vmem:[%s5359_s16 + $0x8] sm:$0xff]  ;;  %s3287_s11 = sshll.u32 %s4769_s0, 4  ;;  %s4592_s0 = smov [#allocation26]  }
 0x2b0   : > { %s5236_s1 = scalar_lea.hbm %s4746_s25, %s3287_s11  ;;  %s4449_s4 = sshll.u32 %s4592_s0, 4  ;;  %s4450_s4 = int_to_ptr.vmem [resolvable:$false] %s4449_s4 }
 0x2b1   : > { %v1222_v43 = vrot.slane %v1221_v42, 1 }
 0x2b3   : > { %v1223_v45 = vadd.f32 %v1222_v43, %v1221_v42 }
 0x2b5   : > { %v5057_v46 = vmul.f32 %v4020_v44, %v1223_v45  ;;  %v3705_v44 = vpack.c.bf16 %v1905_v41, %v1904_v40  ;;  %v1906_v45 = vld [vmem:[%s5359_s16 + $0x10] sm:$0xff]  ;;  %v2323_v41 = vld [vmem:[%s5362_s22 + $0x20] sm:$0xff] }
 0x2b6   : > { %v3708_v50 = vpack.c.bf16 %v1907_v47, %v1906_v45 }
 0x2b7   : > { %3424 = vmatmul.mubr.msk.f32.vlgmr.msra.gmra.mrb[2].mxu0 %vm1213_vm6, %v5057_v46 }
 0x2b8   : > { %3447 = vmatprep.mubr.msk.f32.mxu0 %vm4589_vm4, %v4588_v25 }
 0x38a   : > { %v1315_v54 = vpop.f32.mrb[2].mxu0 }
 0x38b   : > { %v1322_v55 = vrot.slane %v1315_v54, %v1321_v53  ;;  %v3425_v56 = vpop.f32.mrb[3].mxu0  ;;  %v3711_v53 = vpack.c.bf16 %v1909_v52, %v1908_v51  ;;  %v1996_v54 = vld [vmem:[%s5356_s26 + $0x10] sm:$0xff] }
 0x38d   : > { %v1324_v57 = vsub.f32 %v1117_v21, %v1322_v55  ;;  %v1323_v58 = vsub.f32 %v5039_v9, %v1322_v55  ;;  %v3675_v21 = vpack.c.bf16 %v4018_v16, %v4017_v17  ;;  %v1997_v55 = vld [vmem:[%s5356_s26 + $0x18] sm:$0xff]  ;;  %v2084_v17 = vld [vmem:[#allocation16] sm:$0x1] }
 0x38e   : > { %v3717_v56 = vpack.c.bf16 %v1997_v55, %v1996_v54  ;;  %v2553_v54 = vld [vmem:[#allocation19 + $0x18] sm:$0xff] }
 0x38f   : > { %3440 = vmatprep.mubr.msk.f32.mxu1 %vm1127_vm0, %v1323_v58  ;;  %v1999_v58 = vld [vmem:[%s5356_s26 + $0x28] sm:$0xff] }
 0x390   : > { %3441 = vmatmul.mubr.msk.f32.vlgmr.msra.gmra.mrb[0].mxu1 %vm1127_vm0, %v1324_v57  ;;  %v1998_v57 = vld [vmem:[%s5356_s26 + $0x20] sm:$0xff] }
 0x391   : > { %3476 = vmatprep.mubr.msk.f32.mxu1 %vm4589_vm4, %v4588_v25  ;;  %3684 = vmatpush3.bf16.msra.mxu1 %v3683_v63  ;;  %v3720_v60 = vpack.c.bf16 %v1999_v58, %v1998_v57  ;;  %v2555_v57 = vld [vmem:[#allocation19 + $0x28] sm:$0xff] }
 0x392   : > { %3685 = vmatprep.subr.bf16.mxu1 %v4590_v59 }
 0x395   : > { %3687 = vmatpush3.bf16.msra.mxu1 %v3686_v1 }
 0x396   : > { %3688 = vmatprep.subr.bf16.mxu1 %v4590_v59 }
 0x399   : > { %3690 = vmatpush3.bf16.msra.mxu1 %v3689_v4 }
 0x39a   : > { %3691 = vmatprep.subr.bf16.mxu1 %v4590_v59 }
 0x463   : > { %v3442_v6 = vpop.f32.mrb[0].mxu1 }
 0x464   : > { %v1420_v7 = vadd.f32 %v3442_v6, %v3251_v5  ;;  %v1414_v8 = vpop.f32.mrb[1].mxu1 }
 0x465   : > { %v1415_v9 = vadd.f32 %v3251_v5, %v1414_v8  ;;  %v3268_v8 = vld [vmem:[#allocation11] ss:$0 sm:$0xff] }
 0x466   : > { %v1424_v11 = vmax.f32 %v1420_v7, 0.0 }
 0x467   : > { %v1423_v12 = vmax.f32 %v1415_v9, 0.0 }
 0x469   : > { %v3671_v18 = vpack.c.bf16 %v1424_v11, %v1423_v12  ;;  %v2082_v12 = vld [vmem:[#allocation13] sm:$0x1] }
 0x46b   : > { %3673 = vmatpush3.bf16.msk.msra.mxu0 %vm5085_vm9, %v3671_v18 }
 0x46c   : > { %3674 = vmatprep.subr.bf16.mxu0 %v4590_v59 }
 0x46e   : > { %3448 = vmatmul.mubr.msk.f32.vlgmr.msra.gmra.mrb[4].mxu0 %vm1437_vm10, %v1435_v14 }
 0x46f   : > { %3677 = vmatpush3.bf16.msk.msra.mxu0 %vm5085_vm9, %v3675_v21  ;;  %3454 = vmatprep.mubr.msk.f32.mxu0 %vm4589_vm4, %v4588_v25 }
 0x470   : > { %3678 = vmatprep.subr.bf16.mxu0 %v4590_v59 }
 0x472   : > { %3455 = vmatmul.mubr.msk.f32.vlgmr.msra.gmra.mrb[6].mxu0 %vm1437_vm10, %v1516_v22  ;;  %v2327_v22 = vld [vmem:[#allocation17 + $0x10] sm:$0xff] }
 0x473   : > { %3681 = vmatpush3.bf16.msk.msra.mxu0 %vm5085_vm9, %v3671_v18  ;;  %3461 = vmatprep.mubr.msk.f32.mxu0 %vm4589_vm4, %v4588_v25  ;;  %v3726_v24 = vpack.c.bf16 %v2328_v23, %v2327_v22  ;;  %v2640_v22 = vld [vmem:[#allocation23] sm:$0x1] }
 0x474   : > { %3700 = vmatprep.subr.bf16.mxu0 %v4590_v59 }
 0x476   : > { %3462 = vmatmul.mubr.msk.f32.vlgmr.msra.gmra.mrb[8].mxu0 %vm1437_vm10, %v1434_v13  ;;  %v2083_v13 = vld [vmem:[#allocation14] sm:$0x1] }
 0x477   : > { %3703 = vmatpush3.bf16.msk.msra.mxu0 %vm5085_vm9, %v3671_v18  ;;  %3498 = vmatprep.mubr.msk.f32.mxu0 %vm4589_vm4, %v4588_v25  ;;  %v2161_v15 = vadd.f32 %v2083_v13, %v2082_v12 }
 0x478   : > { %3713 = vmatprep.subr.bf16.mxu0 %v4590_v59 }
 0x479   : > { %v2162_v18 = vadd.f32 %v2161_v15, %v2084_v17 }
 0x47a   : > { %3499 = vmatmul.mubr.msk.f32.vlgmr.msra.gmra.mrb[10].mxu0 %vm1437_vm10, %v1436_v20  ;;  %v2326_v20 = vld [vmem:[#allocation17 + $0x8] sm:$0xff] }
 0x47b   : > { %3528 = vmatprep.mubr.msk.f32.mxu0 %vm4589_vm4, %v4588_v25  ;;  %3715 = vmatpush3.bf16.msra.mxu0 %v3714_v26  ;;  %v3723_v21 = vpack.c.bf16 %v2326_v20, %v2325_v19  ;;  %v2329_v26 = vld [vmem:[#allocation17 + $0x20] sm:$0xff]  ;;  %v2720_v19 = vld [vmem:[%s5363_s21 + $0x20] sm:$0xff] }
 0x47c   : > { %3716 = vmatprep.subr.bf16.mxu0 %v4590_v59  ;;  %v3729_v28 = vpack.c.bf16 %v2330_v27, %v2329_v26  ;;  %v2721_v20 = vld [vmem:[%s5363_s21 + $0x28] sm:$0xff]  ;;  %v2797_v27 = vld [vmem:[#allocation25] sm:$0xff] }
 0x47f   : > { %3718 = vmatpush3.bf16.msra.mxu0 %v3717_v56  ;;  %v2554_v56 = vld [vmem:[#allocation19 + $0x20] sm:$0xff] }
 0x480   : > { %3719 = vmatprep.subr.bf16.mxu0 %v4590_v59  ;;  %v3747_v58 = vpack.c.bf16 %v2555_v57, %v2554_v56 }
 0x483   : > { %3721 = vmatpush3.bf16.msra.mxu0 %v3720_v60  ;;  %v2636_v60 = vld [vmem:[#allocation22 + $0x10] sm:$0xff] }
 0x484   : > { %3531 = vmatprep.subr.mxu0 %v4588_v25 }
 0x541   : > { %v5120_v32 = vpop.f32.mrb[4].mxu0 }
 0x542   : > { %v3449_v33 = vpop.f32.mrb[5].mxu0  ;;  %3477 = vmatmul.mubr.msk.f32.vlgmr.msra.gmra.mrb[2].mxu1 %vm1684_vm11, %v5120_v32 }
 0x543   : > { %3693 = vmatpush3.bf16.msra.mxu1 %v3692_v29  ;;  %3491 = vmatprep.mubr.msk.f32.mxu1 %vm4589_vm4, %v4588_v25  ;;  %v2634_v29 = vld [vmem:[#allocation22] sm:$0xff] }
 0x544   : > { %3694 = vmatprep.subr.bf16.mxu1 %v4590_v59  ;;  %v3750_v31 = vpack.c.bf16 %v2635_v30, %v2634_v29  ;;  %v2320_v33 = vld [vmem:[%s5362_s22 + $0x8] sm:$0xff] }
 0x545   : > { %v1588_v37 = vpop.f32.mrb[6].mxu0 }
 0x546   : > { %v3456_v38 = vpop.f32.mrb[7].mxu0  ;;  %v1595_v61 = vadd.f32 1e-06, %v1588_v37  ;;  %vm1592_vm12 = vcmp.ne.f32.partialorder %v1588_v37, 0.0 }
 0x547   : > { %3696 = vmatpush3.bf16.msra.mxu1 %v3695_v34  ;;  %v3259_v0 = vsel %vm1592_vm12, 1.0, %v4588_v25 }
 0x548   : > { %3697 = vmatprep.subr.bf16.mxu1 %v4590_v59  ;;  %4021 = vrcp.f32 %v1595_v61  ;;  %v2637_v61 = vld [vmem:[#allocation22 + $0x18] sm:$0xff] }
 0x549   : > { %v1668_v42 = vpop.f32.mrb[8].mxu0 }
 0x54a   : > { %v3463_v43 = vpop.f32.mrb[9].mxu0 }
 0x54b   : > { %3699 = vmatpush3.bf16.msra.mxu1 %v3698_v39  ;;  %v3735_v39 = vpack.c.bf16 %v2322_v36, %v2321_v35  ;;  %v2801_v35 = vld [vmem:[#allocation25 + $0x20] sm:$0xff]  ;;  %v2802_v36 = vld [vmem:[#allocation25 + $0x28] sm:$0xff] }
 0x54c   : > { %3704 = vmatprep.subr.bf16.mxu1 %v4590_v59 }
 0x54d   : > { %v1900_v48 = vpop.f32.mrb[10].mxu0 }
 0x54e   : > { %3492 = vmatmul.mubr.msk.f32.vlgmr.msra.gmra.mrb[2].mxu1 %vm1684_vm11, %v1668_v42  ;;  %v3500_v49 = vpop.f32.mrb[11].mxu0  ;;  %v2324_v42 = vld [vmem:[%s5362_s22 + $0x28] sm:$0xff] }
 0x54f   : > { %3706 = vmatpush3.bf16.msra.mxu1 %v3705_v44  ;;  %3513 = vmatprep.mubr.msk.f32.mxu1 %vm4589_vm4, %v4588_v25  ;;  %v3738_v47 = vpack.c.bf16 %v2324_v42, %v2323_v41  ;;  %v2551_v49 = vld [vmem:[#allocation19 + $0x8] sm:$0xff] }
 0x550   : > { %3707 = vmatprep.subr.bf16.mxu1 %v4590_v59 }
 0x552   : > { %v4022_v62 = vpop.eup %4021 }
 0x553   : > { %3709 = vmatpush3.bf16.msra.mxu1 %v3708_v50  ;;  %v1597_v63 = vmul.f32 3.0, %v4022_v62  ;;  %v3753_v62 = vpack.c.bf16 %v2637_v61, %v2636_v60 }
 0x554   : > { %3710 = vmatprep.subr.bf16.mxu1 %v4590_v59 }
 0x555   : > { %v1598_v1 = vmul.f32 %v3259_v0, %v1597_v63  ;;  %v2638_v63 = vld [vmem:[#allocation22 + $0x20] sm:$0xff] }
 0x557   : > { %3712 = vmatpush3.bf16.msra.mxu1 %v3711_v53  ;;  %v2552_v53 = vld [vmem:[#allocation19 + $0x10] sm:$0xff] }
 0x558   : > { %3576 = vmatprep.subr.mxu1 %v4588_v25  ;;  %v3744_v55 = vpack.c.bf16 %v2553_v54, %v2552_v53 }
 0x55a   : > { %3514 = vmatmul.mubr.msk.f32.vlgmr.msra.gmra.mrb[2].mxu1 %vm1684_vm11, %v1900_v48  ;;  %v2550_v48 = vld [vmem:[#allocation19] sm:$0xff] }
 0x55b   : > { %3578 = vmatprep.mubr.msk.f32.mxu1 %vm4589_vm4, %v4588_v25  ;;  %v3741_v52 = vpack.c.bf16 %v2551_v49, %v2550_v48 }
 0x62d   : > { %v1979_v2 = vpop.f32.mrb[2].mxu1 }
 0x62e   : > { %v1984_v4 = vmul.f32 %v1979_v2, %v1598_v1  ;;  %v3515_v5 = vpop.f32.mrb[3].mxu1 }
 0x630   : > { %v1992_v6 = vadd.f32 %v3267_v3, %v1984_v4 }
 0x632   : > { %v1993_v7 = vmax.f32 %v1992_v6, 0.0 }
 0x634   : > { %3529 = vmatmul.mubr.msk.f32.vlgmr.msra.gmra.mrb[12].mxu0 %vm1684_vm11, %v1993_v7 }
 0x635   : > { %3533 = vmatprep.mubr.msk.f32.mxu0 %vm4589_vm4, %v4588_v25 }
 0x707   : > { %v2076_v9 = vpop.f32.mrb[12].mxu0 }
 0x708   : > { %v2077_v10 = vadd.f32 %v3268_v8, %v2076_v9  ;;  %v3530_v11 = vpop.f32.mrb[13].mxu0  ;;  %v2631_v8 = vld [vmem:[#allocation20] sm:$0x1] }
 0x709   : > { %v2716_v11 = vld [vmem:[%s5363_s21] sm:$0xff] }
 0x70a   : > { %v2080_v14 = vmax.f32 %v2077_v10, 0.0 }
 0x70c   : > { %v2081_v16 = vadd.f32 %v2080_v14, %v5120_v32  ;;  %v2319_v32 = vld [vmem:[%s5361_s7] sm:$0xff]  ;;  %s2967_s7 = sshll.u32 %s1105_s18, 4  ;;  %s5238_s7 = int_to_ptr.vmem [resolvable:$true] %s2967_s7 }
 0x70d   : > { %v3732_v34 = vpack.c.bf16 %v2320_v33, %v2319_v32  ;;  %v2799_v32 = vld [vmem:[#allocation25 + $0x10] sm:$0xff]  ;;  %v2800_v33 = vld [vmem:[#allocation25 + $0x18] sm:$0xff]  ;;  %s4445_s3 = scalar_lea.vmem %s5238_s7, 16  ;;  %p4452_p6 = scmp.lt.s32.totalorder %s5238_s7, %s4450_s4 }
 0x70e   : > { %3532 = vmatpush3.msk.msra.mxu0 %vm1134_vm3, %v2081_v16  ;;  %3577 = vmatpush3.msk.msra.mxu1 %vm1134_vm3, %v2081_v16  ;;  %p4446_p3 = scmp.ne.s32.totalorder %s5238_s7, %s4445_s3 }
 0x70f   : > { %3534 = vmatmul.mubr.msk.f32.vlgmr.msra.gmra.mrb[14].mxu0 %vm1213_vm6, %v2083_v13  ;;  %3536 = vmatprep.subr.mxu0 %v4588_v25 }
 0x710   : > { %3537 = vmatpush3.msk.msra.mxu0 %vm1134_vm3, %v3259_v0  ;;  %3538 = vmatprep.mubr.msk.f32.mxu0 %vm4589_vm4, %v4588_v25  ;;  %v2639_v0 = vld [vmem:[#allocation22 + $0x28] sm:$0xff]  ;;  %p4447_p12 = pnand %p4446_p3, %p5365_p4 }
 0x711   : > { %3541 = vmatprep.subr.mxu0 %v4588_v25  ;;  %3579 = vmatmul.mubr.msk.f32.vlgmr.msra.gmra.mrb[4].mxu1 %vm1213_vm6, %v2084_v17  ;;  %v3756_v1 = vpack.c.bf16 %v2639_v0, %v2638_v63  ;;  %v2719_v17 = vld [vmem:[%s5363_s21 + $0x18] sm:$0xff] }
 0x712   : > { %3749 = vmatprep.subr.bf16.mxu1 %v4590_v59  ;;  %3608 = vmatprep.mubr.msk.f32.mxu1 %vm4589_vm4, %v4588_v25  ;;  %p4448_p5 = pneg %p4447_p12 }
 0x713   : > { %3539 = vmatmul.mubr.msk.f32.vlgmr.msra.gmra.mrb[16].mxu0 %vm1213_vm6, %v2162_v18  ;;  %3751 = vmatpush3.bf16.msra.mxu1 %v3750_v31 }
 0x714   : > { %3542 = vmatpush3.msk.msra.mxu0 %vm1134_vm3, %v2081_v16  ;;  %3543 = vmatprep.mubr.msk.f32.mxu0 %vm4589_vm4, %v4588_v25  ;;  %v2718_v16 = vld [vmem:[%s5363_s21 + $0x10] sm:$0xff] }
 0x715   : > { %3722 = vmatprep.subr.bf16.mxu0 %v4590_v59  ;;  %3752 = vmatprep.subr.bf16.mxu1 %v4590_v59  ;;  %v3762_v18 = vpack.c.bf16 %v2719_v17, %v2718_v16 }
 0x717   : > { %3544 = vmatmul.mubr.msk.f32.vlgmr.msra.gmra.mrb[18].mxu0 %vm1213_vm6, %v2082_v12  ;;  %3754 = vmatpush3.bf16.msra.mxu1 %v3753_v62  ;;  %v2717_v12 = vld [vmem:[%s5363_s21 + $0x8] sm:$0xff] }
 0x718   : > { %3724 = vmatpush3.bf16.msra.mxu0 %v3723_v21  ;;  %3558 = vmatprep.mubr.msk.f32.mxu0 %vm4589_vm4, %v4588_v25  ;;  %v3759_v14 = vpack.c.bf16 %v2717_v12, %v2716_v11  ;;  %v3765_v21 = vpack.c.bf16 %v2721_v20, %v2720_v19 }
 0x719   : > { %3725 = vmatprep.subr.bf16.mxu0 %v4590_v59  ;;  %3755 = vmatprep.subr.bf16.mxu1 %v4590_v59 }
 0x71b   : > { %3757 = vmatpush3.bf16.msra.mxu1 %v3756_v1 }
 0x71c   : > { %3727 = vmatpush3.bf16.msra.mxu0 %v3726_v24  ;;  %3758 = vmatprep.subr.bf16.mxu1 %v4590_v59 }
 0x71d   : > { %3728 = vmatprep.subr.bf16.mxu0 %v4590_v59 }
 0x720   : > { %3730 = vmatpush3.bf16.msra.mxu0 %v3729_v28  ;;  %v2798_v28 = vld [vmem:[#allocation25 + $0x8] sm:$0xff] }
 0x721   : > { %3731 = vmatprep.subr.bf16.mxu0 %v4590_v59  ;;  %v3768_v30 = vpack.c.bf16 %v2798_v28, %v2797_v27 }
 0x7e2   : > { %v5186_v37 = vpop.f32.mrb[14].mxu0 }
 0x7e3   : > { %3559 = vmatmul.mubr.msk.f32.vlgmr.msra.gmra.mrb[20].mxu0 %vm1684_vm11, %v5186_v37  ;;  %v3535_v38 = vpop.f32.mrb[15].mxu0 }
 0x7e4   : > { %3733 = vmatpush3.bf16.msra.mxu0 %v3732_v34  ;;  %3573 = vmatprep.mubr.msk.f32.mxu0 %vm4589_vm4, %v4588_v25  ;;  %v2546_v40 = vpop.f32.mrb[4].mxu1  ;;  %v3771_v34 = vpack.c.bf16 %v2800_v33, %v2799_v32  ;;  %v2722_v38 = vld [vmem:[%s4731_s9] sm:$0x1] }
 0x7e5   : > { %3734 = vmatprep.subr.bf16.mxu0 %v4590_v59  ;;  %v3580_v43 = vpop.f32.mrb[5].mxu1 }
 0x7e6   : > { %v2235_v44 = vpop.f32.mrb[16].mxu0  ;;  %v2877_v43 = vld [vmem:[#allocation5] sm:$0x7] }
 0x7e7   : > { %v3540_v45 = vpop.f32.mrb[17].mxu0  ;;  %v2242_v2 = vadd.f32 1e-06, %v2235_v44  ;;  %vm2239_vm13 = vcmp.ne.f32.partialorder %v2235_v44, 0.0 }
 0x7e8   : > { %3736 = vmatpush3.bf16.msra.mxu0 %v3735_v39  ;;  %v3274_v5 = vsel %vm2239_vm13, 1.0, %v4588_v25 }
 0x7e9   : > { %3737 = vmatprep.subr.bf16.mxu0 %v4590_v59  ;;  %4023 = vrcp.f32 %v2242_v2 }
 0x7ea   : > { %v2315_v50 = vpop.f32.mrb[18].mxu0 }
 0x7eb   : > { %v3545_v51 = vpop.f32.mrb[19].mxu0 }
 0x7ec   : > { %3739 = vmatpush3.bf16.msra.mxu0 %v3738_v47 }
 0x7ed   : > { %3740 = vmatprep.subr.bf16.mxu0 %v4590_v59 }
 0x7ef   : > { %3574 = vmatmul.mubr.msk.f32.vlgmr.msra.gmra.mrb[20].mxu0 %vm1684_vm11, %v2315_v50 }
 0x7f0   : > { %3742 = vmatpush3.bf16.msra.mxu0 %v3741_v52  ;;  %3593 = vmatprep.mubr.msk.f32.mxu0 %vm4589_vm4, %v4588_v25 }
 0x7f1   : > { %3743 = vmatprep.subr.bf16.mxu0 %v4590_v59 }
 0x7f3   : > { %v4024_v3 = vpop.eup %4023 }
 0x7f4   : > { %3745 = vmatpush3.bf16.msra.mxu0 %v3744_v55  ;;  %v2244_v4 = vmul.f32 3.0, %v4024_v3 }
 0x7f5   : > { %3746 = vmatprep.subr.bf16.mxu0 %v4590_v59 }
 0x7f6   : > { %v2245_v6 = vmul.f32 %v3274_v5, %v2244_v4 }
 0x7f8   : > { %3748 = vmatpush3.bf16.msra.mxu0 %v3747_v58 }
 0x7fb   : > { %3594 = vmatmul.mubr.msk.f32.vlgmr.msra.gmra.mrb[20].mxu0 %vm1684_vm11, %v2546_v40 }
 0x8ce   : > { %v2625_v7 = vpop.f32.mrb[20].mxu0 }
 0x8cf   : > { %v2630_v9 = vmul.f32 %v2625_v7, %v2245_v6  ;;  %v3595_v10 = vpop.f32.mrb[21].mxu0 }
 0x8d1   : > { %v2632_v13 = vadd.f32 %v2631_v8, %v2630_v9 }
 0x8d3   : > { %v2633_v15 = vmax.f32 %v2632_v13, 0.0 }
 0x8d5   : > { %3609 = vmatmul.mubr.msk.f32.vlgmr.msra.gmra.mrb[6].mxu1 %vm1684_vm11, %v2633_v15 }
 0x8d6   : > { %3760 = vmatpush3.bf16.msra.mxu1 %v3759_v14  ;;  %3623 = vmatprep.mubr.msk.f32.mxu1 %vm4589_vm4, %v4588_v25 }
 0x8d7   : > { %3761 = vmatprep.subr.bf16.mxu1 %v4590_v59 }
 0x8da   : > { %3763 = vmatpush3.bf16.msra.mxu1 %v3762_v18 }
 0x8db   : > { %3764 = vmatprep.subr.bf16.mxu1 %v4590_v59 }
 0x8de   : > { %3766 = vmatpush3.bf16.msra.mxu1 %v3765_v21 }
 0x8df   : > { %3767 = vmatprep.subr.bf16.mxu1 %v4590_v59 }
 0x9a8   : > { %v2710_v23 = vpop.f32.mrb[6].mxu1 }
 0x9a9   : > { %v2711_v24 = vadd.f32 %v2710_v23, %v2640_v22  ;;  %v3610_v26 = vpop.f32.mrb[7].mxu1 }
 0x9ab   : > { %v2714_v29 = vmax.f32 %v2711_v24, 0.0 }
 0x9ad   : > { %v2715_v31 = vadd.f32 %v2714_v29, %v5186_v37  ;;  %v3774_v37 = vpack.c.bf16 %v2802_v36, %v2801_v35 }
 0x9af   : > { %3624 = vmatmul.mubr.msk.f32.vlgmr.msra.gmra.mrb[8].mxu1 %vm1684_vm11, %v2715_v31 }
 0x9b0   : > { %3769 = vmatpush3.bf16.msra.mxu1 %v3768_v30  ;;  %3638 = vmatprep.mubr.msk.f32.mxu1 %vm4589_vm4, %v4588_v25 }
 0x9b1   : > { %3770 = vmatprep.subr.bf16.mxu1 %v4590_v59 }
 0x9b4   : > { %3772 = vmatpush3.bf16.msra.mxu1 %v3771_v34 }
 0x9b5   : > { %3773 = vmatprep.subr.bf16.mxu1 %v4590_v59  ;;  %v2803_v59 = vld [vmem:[%s5364_s5] sm:$0x1]  ;;  %s4451_s5 = scalar_lea.vmem %s4450_s4, 32 }
 0x9b6   : > { %p4453_p9 = scmp.lt.s32.totalorder %s4451_s5, %s4445_s3 }
 0x9b8   : > { %3775 = vmatpush3.bf16.msra.mxu1 %v3774_v37  ;;  %p4454_p10 = por %p4453_p9, %p4452_p6 }
 0x9b9   : > { %3641 = vmatprep.subr.mxu1 %v4588_v25 }
 0x9ba   : > { %p4455_p7 = pnand %p4454_p10, %p4448_p5 }
 0xa82   : > { %v2792_v39 = vpop.f32.mrb[8].mxu1 }
 0xa83   : > { %v2793_v40 = vadd.f32 %v2792_v39, %v2722_v38  ;;  %v3625_v41 = vpop.f32.mrb[9].mxu1 }
 0xa85   : > { %v2796_v42 = vmax.f32 %v2793_v40, 0.0 }
 0xa87   : > { %3639 = vmatmul.mubr.msk.f32.vlgmr.msra.gmra.mrb[10].mxu1 %vm1684_vm11, %v2796_v42 }
 0xa88   : > { %3642 = vmatpush3.msk.msra.mxu1 %vm1134_vm3, %v2877_v43  ;;  %3643 = vmatprep.mubr.msk.f32.mxu1 %vm4589_vm4, %v4588_v25 }
 0xa8f   : > { %3644 = vmatmul.mubr.msk.f32.vlgmr.msra.gmra.mrb[10].mxu1 %vm1213_vm6, %v5057_v46 }
 0xb62   : > { %v2947_v44 = vpop.f32.mrb[10].mxu1 }
 0xb63   : > { %v3776_v45 = vadd.f32 %v2947_v44, %v2803_v59  ;;  %v3645_v47 = vpop.f32.mrb[11].mxu1 }
 0xb65   : > { %2953 = vst.msk [vmem:[%s1105_s18] sm:$0x1] %vm2952_vm14, %v3776_v45 }
 0xb66   : > { %4458 = shalt.err (!%p4455_p7)
}
 0xb67   : > { %s4459_s23 = scalar_lea.hbm %s5236_s1, 16  ;;  %s4463_s11 = scalar_lea.hbm %s4746_s25, 32 }
 0xb68   : > { %p4460_p8 = scmp.ne.s32.totalorder %s5236_s1, %s4459_s23  ;;  %p4464_p1 = scmp.lt.u32.totalorder %s5236_s1, %s4746_s25 }
 0xb69   : > { %p4465_p0 = scmp.lt.u32.totalorder %s4463_s11, %s4459_s23  ;;  %p4467_p3 = scmp.lt.u32.totalorder %s4459_s23, %s5236_s1 }
 0xb6a   : > { %p4461_p11 = pnand %p4460_p8, %p5365_p4 }
 0xb6b   : > { %p4466_p2 = por %p4465_p0, %p4464_p1 }
 0xb6c   : > { %p4462_p13 = pneg %p4461_p11 }
 0xb6d   : > { %p4468_p12 = por %p4467_p3, %p4466_p2 }
 0xb6f   : > { %p4469_p5 = pnand %p4468_p12, %p4462_p13 }
 0xb71   : > { %4472 = shalt.err (!%p4469_p5)
}
 0xb72   : > { %3847 = dma.vmem_to_hbm [thread:$0]  (%p5365_p4), %s5238_s7, 16, %s5236_s1, %s2955_s2  }
 0xb73 PF: > { %s5366_s5 = sld [smem:[#allocation53_spill]]  ;;  %s5367_s3 = sld [smem:[#allocation57_spill]] }
 0xb74   : > { %p3929_p6 = scmp.ge.s32.totalorder %s4539_s15, 2 }
 0xb79   : > { %s2979_s4 = sand.u32 1, %s5366_s5   ;;  %p5368_p9 = scmp.ne.s32.totalorder %s5367_s3, 0 }
 0xb7a   : > { %s2980_s18 = scalar_lea.sflag [#allocation4], %s2979_s4 }
 0xb7b   : > { %p3896_p10 = pnand %p3929_p6, %p5368_p9 }
 0xb7d   : > { %4522 = dma.done.wait (!%p3896_p10), %s2980_s18, 16  }
 0xb7e   : > { %4524 = vsyncadd (!%p3896_p10), %s2980_s18, 4294967280  ;;  %s5369_s15 = sld [smem:[#allocation55_spill]]  ;;  %s5370_s0 = sld [smem:[#allocation54_spill]] }
 0xb7f   : > { %s5371_s11 = sld [smem:[#allocation56_spill]]  ;;  %s5372_s7 = smov %s4531_s10 }
 0xb84   : > { %p77_p7 = scmp.ge.s32.totalorder %s5369_s15, 4   ;;  %s5373_s10 = smov %s5370_s0 }
 0xb86   :  { %79 = sbr.rel (!%p77_p7) target bundleno = 62 (0x3e), region = 264 }
 0xb8d   :  { %2984 = vsyncpa [#allocation3], 1 }
 0xb8e   :  { %2986 = vsyncpa [#allocation3 + $0x1], 1 }
 0xb8f   :  { %2987 = vsyncpa [#allocation6], 1 }
 0xb90   :  { %2988 = vsyncpa [#allocation9], 1 }
 0xb91   :  { %2989 = vsyncpa [#allocation12], 1 }
 0xb92   :  { %2990 = vsyncpa [#allocation15], 1 }
 0xb93   :  { %2991 = vsyncpa [#allocation18], 1 }
 0xb94   :  { %2992 = vsyncpa [#allocation21], 1 }
 0xb95   :  { %2993 = vsyncpa [#allocation24], 1 }
 0xb96   :  { %2994 = vsyncpa [#allocation4], 1 }
 0xb97   :  { %2996 = vsyncpa [#allocation4 + $0x1], 1 }

</bundles_post_ra>
